<compile_context>
chip_gen: v7x
topology: tpu7x:2x2x1
jax: 0.10.0
libtpu: 0.0.40
codegen_flags: <defaults>
</compile_context>

<pallas_src>
import functools

import jax
import jax.numpy as jnp
from jax.experimental import pallas as pl
from jax.experimental.pallas import tpu as pltpu


def _round_up(n, m):
    return ((n + m - 1) // m) * m


def _lstm_kernel(x_ref, wih_ref, whh_ref, b_ref, w1_ref, b1_ref,
                 out_ref, h_out_ref, gx_ref, *, seq_len, hidden_pad):
    """Entire LSTM + head in one kernel invocation.

    x_ref    : (S, Bp, Ep)       time-major input, zero-padded
    wih_ref  : (Ep, 4*Hp)        W_ih^T, gate blocks lane-padded
    whh_ref  : (Hp, 4*Hp)        W_hh^T, gate blocks lane-padded
    b_ref    : (1, 4*Hp)         b_ih + b_hh, gate blocks lane-padded
    w1_ref   : (Hp, Hp)          head weights (real block is [:H, :3])
    b1_ref   : (1, Hp)           head bias   (real block is [:3])
    out_ref  : (Bp, Hp)          sigmoid(linear(h_final)) (real block is [:B, :3])
    h_out_ref: (Bp, Hp)          final hidden state       (real block is [:B, :H])
    gx_ref   : (S*Bp, 4*Hp)      VMEM scratch: precomputed x_t @ W_ih^T + b
    """
    S = seq_len
    Hp = hidden_pad
    Bp = out_ref.shape[0]
    Ep = x_ref.shape[-1]

    # ---- time-parallel input projection: one MXU push + one vectorized bias add.
    # (S, Bp, Ep) -> (S*Bp, Ep): Bp is a multiple of 8, Ep a multiple of 128,
    # so the merge is (8,128)-tile aligned.
    x_flat = x_ref[...].reshape(S * Bp, Ep)
    gx_ref[...] = (jnp.dot(x_flat, wih_ref[...],
                           preferred_element_type=jnp.float32) + b_ref[...])

    whh = whh_ref[...]          # (Hp, 4*Hp) -- hoisted, loop-invariant

    def step(s, carry):
        h, c = carry
        row = pl.multiple_of(s * Bp, Bp)
        g_x = gx_ref[pl.ds(row, Bp), :]                       # (Bp, 4*Hp)
        # Only the recurrent matmul sits on the serial critical path.
        gates = g_x + jnp.dot(h, whh, preferred_element_type=jnp.float32)

        # PyTorch gate order i, f, g, o -- each slice is a full 128-lane block.
        i_g = jax.nn.sigmoid(gates[:, 0 * Hp:1 * Hp])
        f_g = jax.nn.sigmoid(gates[:, 1 * Hp:2 * Hp])
        g_g = jnp.tanh(gates[:, 2 * Hp:3 * Hp])
        o_g = jax.nn.sigmoid(gates[:, 3 * Hp:4 * Hp])

        c_new = f_g * c + i_g * g_g
        h_new = o_g * jnp.tanh(c_new)
        return (h_new, c_new)

    h0 = jnp.zeros((Bp, Hp), jnp.float32)
    c0 = jnp.zeros((Bp, Hp), jnp.float32)
    h_fin, _ = jax.lax.fori_loop(0, seq_len, step, (h0, c0), unroll=True)

    # Head: Linear(H, 3) + Sigmoid, computed lane-dense (padding cols are zero).
    logits = jnp.dot(h_fin, w1_ref[...],
                     preferred_element_type=jnp.float32) + b1_ref[...]
    out_ref[...] = jax.nn.sigmoid(logits)
    h_out_ref[...] = h_fin


def _pad_gate_cols(wt, H, H_pad):
    """(rows, 4H) -> (rows, 4*H_pad): each gate's H cols zero-padded to H_pad lanes."""
    rows = wt.shape[0]
    wt4 = wt.reshape(rows, 4, H)
    wt4 = jnp.pad(wt4, ((0, 0), (0, 0), (0, H_pad - H)))
    return wt4.reshape(rows, 4 * H_pad)


def simple_lstm_forward(x, params):
    """x: (B, S, E) float32 (batch_first, like PyTorch). Returns (output, h_n[-1])."""
    B, S, E = x.shape
    w_ih, w_hh, b_ih, b_hh, w1, b1 = (params[k] for k in
                                      ("w_ih", "w_hh", "b_ih", "b_hh", "w1", "b1"))
    H = w_hh.shape[1]

    # Padded layout: sublane-width batch, lane-width gate / hidden / embed blocks.
    B_pad = max(8, _round_up(B, 8))
    H_pad = _round_up(H, 128)
    E_pad = _round_up(E, 128)

    # --- glue (plain JAX, all tiny one-time ops) -------------------------------
    # Time-major, zero-padded input (S, B_pad, E_pad).
    x_tm = jnp.zeros((S, B_pad, E_pad), jnp.float32)
    x_tm = x_tm.at[:, :B, :E].set(jnp.transpose(x, (1, 0, 2)))

    # Gate-column-padded, row-padded weights.  Zero padding keeps padded c/h
    # lanes exactly 0 (tanh(0)=0 candidate => padded cell state never drifts).
    wih_p = jnp.pad(_pad_gate_cols(w_ih.T, H, H_pad), ((0, E_pad - E), (0, 0)))  # (Ep, 4Hp)
    whh_p = jnp.pad(_pad_gate_cols(w_hh.T, H, H_pad), ((0, H_pad - H), (0, 0)))  # (Hp, 4Hp)
    b_pad = _pad_gate_cols((b_ih + b_hh).reshape(1, 4 * H), H, H_pad)            # (1, 4Hp)

    # Lane-dense head: real weights in [:H, :3], rest zero.
    w1_pad = jnp.zeros((H_pad, H_pad), jnp.float32).at[:H, :3].set(w1.T)
    b1_pad = jnp.zeros((1, H_pad), jnp.float32).at[0, :3].set(b1)

    kernel = functools.partial(_lstm_kernel, seq_len=S, hidden_pad=H_pad)

    out_p, h_p = pl.pallas_call(
        kernel,
        out_shape=(jax.ShapeDtypeStruct((B_pad, H_pad), jnp.float32),
                   jax.ShapeDtypeStruct((B_pad, H_pad), jnp.float32)),
        grid_spec=pltpu.PrefetchScalarGridSpec(
            num_scalar_prefetch=0,
            grid=(1,),
            in_specs=[
                pl.BlockSpec((S, B_pad, E_pad), lambda i: (0, 0, 0)),        # x
                pl.BlockSpec((E_pad, 4 * H_pad), lambda i: (0, 0)),          # W_ih^T
                pl.BlockSpec((H_pad, 4 * H_pad), lambda i: (0, 0)),          # W_hh^T
                pl.BlockSpec((1, 4 * H_pad), lambda i: (0, 0)),              # bias
                pl.BlockSpec((H_pad, H_pad), lambda i: (0, 0)),              # W1 (padded)
                pl.BlockSpec((1, H_pad), lambda i: (0, 0)),                  # b1 (padded)
            ],
            out_specs=[
                pl.BlockSpec((B_pad, H_pad), lambda i: (0, 0)),              # head out
                pl.BlockSpec((B_pad, H_pad), lambda i: (0, 0)),              # h_n[-1]
            ],
            scratch_shapes=[
                pltpu.VMEM((S * B_pad, 4 * H_pad), jnp.float32),             # gx
            ],
        ),
        compiler_params=pltpu.CompilerParams(
            dimension_semantics=("arbitrary",)),
    )(x_tm, wih_p, whh_p, b_pad, w1_pad, b1_pad)

    # Strip padding.
    return out_p[:B, :3], h_p[:B, :H]


def init_params(key, embedding_dim, hidden_dim):
    """Deterministic init mirroring nn.LSTM / nn.Linear uniform(-1/sqrt(H), 1/sqrt(H))."""
    H, E = hidden_dim, embedding_dim
    k = 1.0 / jnp.sqrt(jnp.float32(H))
    ks = jax.random.split(key, 6)
    u = lambda kk, shape: jax.random.uniform(kk, shape, jnp.float32, -k, k)
    return {
        "w_ih": u(ks[0], (4 * H, E)),
        "w_hh": u(ks[1], (4 * H, H)),
        "b_ih": u(ks[2], (4 * H,)),
        "b_hh": u(ks[3], (4 * H,)),
        "w1":   u(ks[4], (3, H)),
        "b1":   u(ks[5], (3,)),
    }


def _reference_forward(x, params):
    """Pure-JAX reference (lax.scan LSTM) to sanity-check the kernel."""
    B, S, E = x.shape
    H = params["w_hh"].shape[1]
    wih_t = params["w_ih"].T
    whh_t = params["w_hh"].T
    b = params["b_ih"] + params["b_hh"]

    def step(carry, x_t):
        h, c = carry
        g = x_t @ wih_t + h @ whh_t + b
        i = jax.nn.sigmoid(g[:, 0 * H:1 * H])
        f = jax.nn.sigmoid(g[:, 1 * H:2 * H])
        gg = jnp.tanh(g[:, 2 * H:3 * H])
        o = jax.nn.sigmoid(g[:, 3 * H:4 * H])
        c = f * c + i * gg
        h = o * jnp.tanh(c)
        return (h, c), None

    h0 = jnp.zeros((B, H), jnp.float32)
    (h, _), _ = jax.lax.scan(step, (h0, h0), jnp.transpose(x, (1, 0, 2)))
    out = jax.nn.sigmoid(h @ params["w1"].T + params["b1"])
    return out, h


if __name__ == "__main__":
    # Small shapes consistent with the module: batch=2, seq=8, embed=16, hidden=32.
    B, S, E, H = 2, 8, 16, 32
    key = jax.random.PRNGKey(0)
    k_x, k_p = jax.random.split(key)
    x = jax.random.normal(k_x, (B, S, E), jnp.float32)
    params = init_params(k_p, E, H)

    out, h_last = jax.block_until_ready(simple_lstm_forward(x, params))

    ref_out, ref_h = _reference_forward(x, params)
    assert jnp.allclose(out, ref_out, atol=1e-5, rtol=1e-5)
    assert jnp.allclose(h_last, ref_h, atol=1e-5, rtol=1e-5)

    print("KERNEL_OK")
</pallas_src>

<mosaic_0001>
module attributes {stable_mosaic.version = 11 : i64} {
  func.func @_lstm_kernel(%arg0: i32, %arg1: memref<8x8x128xf32, #tpu.memory_space<vmem>>, %arg2: memref<128x512xf32, #tpu.memory_space<vmem>>, %arg3: memref<128x512xf32, #tpu.memory_space<vmem>>, %arg4: memref<1x512xf32, #tpu.memory_space<vmem>>, %arg5: memref<128x128xf32, #tpu.memory_space<vmem>>, %arg6: memref<1x128xf32, #tpu.memory_space<vmem>>, %arg7: memref<8x128xf32, #tpu.memory_space<vmem>>, %arg8: memref<8x128xf32, #tpu.memory_space<vmem>>, %arg9: memref<64x512xf32, #tpu.memory_space<vmem>>) attributes {dimension_semantics = [#tpu.dimension_semantics<arbitrary>], iteration_bounds = array<i64: 1>, scalar_prefetch = 0 : i64, scratch_operands = 1 : i64, tpu.core_type = #tpu.core_type<tc>, window_params = [{pipeline_mode = #tpu.pipeline_mode<synchronous>, transform_indices = @transform_0, window_bounds = array<i64: 8, 8, 128>}, {pipeline_mode = #tpu.pipeline_mode<synchronous>, transform_indices = @transform_1, window_bounds = array<i64: 128, 512>}, {pipeline_mode = #tpu.pipeline_mode<synchronous>, transform_indices = @transform_2, window_bounds = array<i64: 128, 512>}, {pipeline_mode = #tpu.pipeline_mode<synchronous>, transform_indices = @transform_3, window_bounds = array<i64: 1, 512>}, {pipeline_mode = #tpu.pipeline_mode<synchronous>, transform_indices = @transform_4, window_bounds = array<i64: 128, 128>}, {pipeline_mode = #tpu.pipeline_mode<synchronous>, transform_indices = @transform_5, window_bounds = array<i64: 1, 128>}, {pipeline_mode = #tpu.pipeline_mode<synchronous>, transform_indices = @transform_6, window_bounds = array<i64: 8, 128>}, {pipeline_mode = #tpu.pipeline_mode<synchronous>, transform_indices = @transform_7, window_bounds = array<i64: 8, 128>}]} {
    %c0 = arith.constant 0 : index
    %c0_0 = arith.constant 0 : index
    %c0_1 = arith.constant 0 : index
    %0 = vector.load %arg1[%c0, %c0_0, %c0_1] : memref<8x8x128xf32, #tpu.memory_space<vmem>>, vector<8x8x128xf32>
    %1 = vector.shape_cast %0 : vector<8x8x128xf32> to vector<64x128xf32>
    %c0_2 = arith.constant 0 : index
    %c0_3 = arith.constant 0 : index
    %2 = vector.load %arg2[%c0_2, %c0_3] : memref<128x512xf32, #tpu.memory_space<vmem>>, vector<128x512xf32>
    %cst = arith.constant dense<0.000000e+00> : vector<64x512xf32>
    %3 = tpu.matmul %1, %2, %cst {dimension_numbers = #tpu.dot_dimension_numbers<[1], [0], [0], [1], [0, 0, 1, 1], [], []>} : vector<64x128xf32>, vector<128x512xf32>, vector<64x512xf32> -> vector<64x512xf32>
    %c0_4 = arith.constant 0 : index
    %c0_5 = arith.constant 0 : index
    %4 = vector.load %arg4[%c0_4, %c0_5] : memref<1x512xf32, #tpu.memory_space<vmem>>, vector<1x512xf32>
    %5 = vector.broadcast %4 : vector<1x512xf32> to vector<64x512xf32>
    %6 = arith.addf %3, %5 : vector<64x512xf32>
    %c0_6 = arith.constant 0 : index
    %c0_7 = arith.constant 0 : index
    %7 = vector.load %arg9[%c0_6, %c0_7] : memref<64x512xf32, #tpu.memory_space<vmem>>, vector<64x512xf32>
    tpu.vector_store %arg9[%c0_6, %c0_7], %6 {strides = array<i32>} : memref<64x512xf32, #tpu.memory_space<vmem>>, vector<64x512xf32>,
    %c0_8 = arith.constant 0 : index
    %c0_9 = arith.constant 0 : index
    %8 = vector.load %arg3[%c0_8, %c0_9] : memref<128x512xf32, #tpu.memory_space<vmem>>, vector<128x512xf32>
    %cst_10 = arith.constant 0.000000e+00 : f32
    %9 = vector.broadcast %cst_10 : f32 to vector<8x128xf32>
    %cst_11 = arith.constant 0.000000e+00 : f32
    %10 = vector.broadcast %cst_11 : f32 to vector<8x128xf32>
    %c0_i32 = arith.constant 0 : i32
    %c8_i32 = arith.constant 8 : i32
    %11 = arith.muli %c0_i32, %c8_i32 : i32
    %12 = tpu.assume_multiple %11, 8 : i32
    %13 = arith.index_cast %12 : i32 to index
    %c0_12 = arith.constant 0 : index
    %14 = vector.load %arg9[%13, %c0_12] : memref<64x512xf32, #tpu.memory_space<vmem>>, vector<8x512xf32>
    %cst_13 = arith.constant dense<0.000000e+00> : vector<8x512xf32>
    %15 = tpu.matmul %9, %8, %cst_13 {dimension_numbers = #tpu.dot_dimension_numbers<[1], [0], [0], [1], [0, 0, 1, 1], [], []>} : vector<8x128xf32>, vector<128x512xf32>, vector<8x512xf32> -> vector<8x512xf32>
    %16 = arith.addf %14, %15 : vector<8x512xf32>
    %17 = vector.extract_strided_slice %16 {offsets = [0, 0], sizes = [8, 128], strides = [1, 1]} : vector<8x512xf32> to vector<8x128xf32>
    %18 = arith.negf %17 : vector<8x128xf32>
    %19 = math.exp %18 : vector<8x128xf32>
    %cst_14 = arith.constant 1.000000e+00 : f32
    %20 = vector.broadcast %cst_14 : f32 to vector<8x128xf32>
    %21 = arith.addf %20, %19 : vector<8x128xf32>
    %22 = arith.divf %20, %21 : vector<8x128xf32>
    %23 = vector.extract_strided_slice %16 {offsets = [0, 128], sizes = [8, 128], strides = [1, 1]} : vector<8x512xf32> to vector<8x128xf32>
    %24 = arith.negf %23 : vector<8x128xf32>
    %25 = math.exp %24 : vector<8x128xf32>
    %cst_15 = arith.constant 1.000000e+00 : f32
    %26 = vector.broadcast %cst_15 : f32 to vector<8x128xf32>
    %27 = arith.addf %26, %25 : vector<8x128xf32>
    %28 = arith.divf %26, %27 : vector<8x128xf32>
    %29 = vector.extract_strided_slice %16 {offsets = [0, 256], sizes = [8, 128], strides = [1, 1]} : vector<8x512xf32> to vector<8x128xf32>
    %30 = math.tanh %29 : vector<8x128xf32>
    %31 = vector.extract_strided_slice %16 {offsets = [0, 384], sizes = [8, 128], strides = [1, 1]} : vector<8x512xf32> to vector<8x128xf32>
    %32 = arith.negf %31 : vector<8x128xf32>
    %33 = math.exp %32 : vector<8x128xf32>
    %cst_16 = arith.constant 1.000000e+00 : f32
    %34 = vector.broadcast %cst_16 : f32 to vector<8x128xf32>
    %35 = arith.addf %34, %33 : vector<8x128xf32>
    %36 = arith.divf %34, %35 : vector<8x128xf32>
    %37 = arith.mulf %28, %10 : vector<8x128xf32>
    %38 = arith.mulf %22, %30 : vector<8x128xf32>
    %39 = arith.addf %37, %38 : vector<8x128xf32>
    %40 = math.tanh %39 : vector<8x128xf32>
    %41 = arith.mulf %36, %40 : vector<8x128xf32>
    %c1_i32 = arith.constant 1 : i32
    %c8_i32_17 = arith.constant 8 : i32
    %42 = arith.muli %c1_i32, %c8_i32_17 : i32
    %43 = tpu.assume_multiple %42, 8 : i32
    %44 = arith.index_cast %43 : i32 to index
    %c0_18 = arith.constant 0 : index
    %45 = vector.load %arg9[%44, %c0_18] : memref<64x512xf32, #tpu.memory_space<vmem>>, vector<8x512xf32>
    %cst_19 = arith.constant dense<0.000000e+00> : vector<8x512xf32>
    %46 = tpu.matmul %41, %8, %cst_19 {dimension_numbers = #tpu.dot_dimension_numbers<[1], [0], [0], [1], [0, 0, 1, 1], [], []>} : vector<8x128xf32>, vector<128x512xf32>, vector<8x512xf32> -> vector<8x512xf32>
    %47 = arith.addf %45, %46 : vector<8x512xf32>
    %48 = vector.extract_strided_slice %47 {offsets = [0, 0], sizes = [8, 128], strides = [1, 1]} : vector<8x512xf32> to vector<8x128xf32>
    %49 = arith.negf %48 : vector<8x128xf32>
    %50 = math.exp %49 : vector<8x128xf32>
    %cst_20 = arith.constant 1.000000e+00 : f32
    %51 = vector.broadcast %cst_20 : f32 to vector<8x128xf32>
    %52 = arith.addf %51, %50 : vector<8x128xf32>
    %53 = arith.divf %51, %52 : vector<8x128xf32>
    %54 = vector.extract_strided_slice %47 {offsets = [0, 128], sizes = [8, 128], strides = [1, 1]} : vector<8x512xf32> to vector<8x128xf32>
    %55 = arith.negf %54 : vector<8x128xf32>
    %56 = math.exp %55 : vector<8x128xf32>
    %cst_21 = arith.constant 1.000000e+00 : f32
    %57 = vector.broadcast %cst_21 : f32 to vector<8x128xf32>
    %58 = arith.addf %57, %56 : vector<8x128xf32>
    %59 = arith.divf %57, %58 : vector<8x128xf32>
    %60 = vector.extract_strided_slice %47 {offsets = [0, 256], sizes = [8, 128], strides = [1, 1]} : vector<8x512xf32> to vector<8x128xf32>
    %61 = math.tanh %60 : vector<8x128xf32>
    %62 = vector.extract_strided_slice %47 {offsets = [0, 384], sizes = [8, 128], strides = [1, 1]} : vector<8x512xf32> to vector<8x128xf32>
    %63 = arith.negf %62 : vector<8x128xf32>
    %64 = math.exp %63 : vector<8x128xf32>
    %cst_22 = arith.constant 1.000000e+00 : f32
    %65 = vector.broadcast %cst_22 : f32 to vector<8x128xf32>
    %66 = arith.addf %65, %64 : vector<8x128xf32>
    %67 = arith.divf %65, %66 : vector<8x128xf32>
    %68 = arith.mulf %59, %39 : vector<8x128xf32>
    %69 = arith.mulf %53, %61 : vector<8x128xf32>
    %70 = arith.addf %68, %69 : vector<8x128xf32>
    %71 = math.tanh %70 : vector<8x128xf32>
    %72 = arith.mulf %67, %71 : vector<8x128xf32>
    %c2_i32 = arith.constant 2 : i32
    %c8_i32_23 = arith.constant 8 : i32
    %73 = arith.muli %c2_i32, %c8_i32_23 : i32
    %74 = tpu.assume_multiple %73, 8 : i32
    %75 = arith.index_cast %74 : i32 to index
    %c0_24 = arith.constant 0 : index
    %76 = vector.load %arg9[%75, %c0_24] : memref<64x512xf32, #tpu.memory_space<vmem>>, vector<8x512xf32>
    %cst_25 = arith.constant dense<0.000000e+00> : vector<8x512xf32>
    %77 = tpu.matmul %72, %8, %cst_25 {dimension_numbers = #tpu.dot_dimension_numbers<[1], [0], [0], [1], [0, 0, 1, 1], [], []>} : vector<8x128xf32>, vector<128x512xf32>, vector<8x512xf32> -> vector<8x512xf32>
    %78 = arith.addf %76, %77 : vector<8x512xf32>
    %79 = vector.extract_strided_slice %78 {offsets = [0, 0], sizes = [8, 128], strides = [1, 1]} : vector<8x512xf32> to vector<8x128xf32>
    %80 = arith.negf %79 : vector<8x128xf32>
    %81 = math.exp %80 : vector<8x128xf32>
    %cst_26 = arith.constant 1.000000e+00 : f32
    %82 = vector.broadcast %cst_26 : f32 to vector<8x128xf32>
    %83 = arith.addf %82, %81 : vector<8x128xf32>
    %84 = arith.divf %82, %83 : vector<8x128xf32>
    %85 = vector.extract_strided_slice %78 {offsets = [0, 128], sizes = [8, 128], strides = [1, 1]} : vector<8x512xf32> to vector<8x128xf32>
    %86 = arith.negf %85 : vector<8x128xf32>
    %87 = math.exp %86 : vector<8x128xf32>
    %cst_27 = arith.constant 1.000000e+00 : f32
    %88 = vector.broadcast %cst_27 : f32 to vector<8x128xf32>
    %89 = arith.addf %88, %87 : vector<8x128xf32>
    %90 = arith.divf %88, %89 : vector<8x128xf32>
    %91 = vector.extract_strided_slice %78 {offsets = [0, 256], sizes = [8, 128], strides = [1, 1]} : vector<8x512xf32> to vector<8x128xf32>
    %92 = math.tanh %91 : vector<8x128xf32>
    %93 = vector.extract_strided_slice %78 {offsets = [0, 384], sizes = [8, 128], strides = [1, 1]} : vector<8x512xf32> to vector<8x128xf32>
    %94 = arith.negf %93 : vector<8x128xf32>
    %95 = math.exp %94 : vector<8x128xf32>
    %cst_28 = arith.constant 1.000000e+00 : f32
    %96 = vector.broadcast %cst_28 : f32 to vector<8x128xf32>
    %97 = arith.addf %96, %95 : vector<8x128xf32>
    %98 = arith.divf %96, %97 : vector<8x128xf32>
    %99 = arith.mulf %90, %70 : vector<8x128xf32>
    %100 = arith.mulf %84, %92 : vector<8x128xf32>
    %101 = arith.addf %99, %100 : vector<8x128xf32>
    %102 = math.tanh %101 : vector<8x128xf32>
    %103 = arith.mulf %98, %102 : vector<8x128xf32>
    %c3_i32 = arith.constant 3 : i32
    %c8_i32_29 = arith.constant 8 : i32
    %104 = arith.muli %c3_i32, %c8_i32_29 : i32
    %105 = tpu.assume_multiple %104, 8 : i32
    %106 = arith.index_cast %105 : i32 to index
    %c0_30 = arith.constant 0 : index
    %107 = vector.load %arg9[%106, %c0_30] : memref<64x512xf32, #tpu.memory_space<vmem>>, vector<8x512xf32>
    %cst_31 = arith.constant dense<0.000000e+00> : vector<8x512xf32>
    %108 = tpu.matmul %103, %8, %cst_31 {dimension_numbers = #tpu.dot_dimension_numbers<[1], [0], [0], [1], [0, 0, 1, 1], [], []>} : vector<8x128xf32>, vector<128x512xf32>, vector<8x512xf32> -> vector<8x512xf32>
    %109 = arith.addf %107, %108 : vector<8x512xf32>
    %110 = vector.extract_strided_slice %109 {offsets = [0, 0], sizes = [8, 128], strides = [1, 1]} : vector<8x512xf32> to vector<8x128xf32>
    %111 = arith.negf %110 : vector<8x128xf32>
    %112 = math.exp %111 : vector<8x128xf32>
    %cst_32 = arith.constant 1.000000e+00 : f32
    %113 = vector.broadcast %cst_32 : f32 to vector<8x128xf32>
    %114 = arith.addf %113, %112 : vector<8x128xf32>
    %115 = arith.divf %113, %114 : vector<8x128xf32>
    %116 = vector.extract_strided_slice %109 {offsets = [0, 128], sizes = [8, 128], strides = [1, 1]} : vector<8x512xf32> to vector<8x128xf32>
    %117 = arith.negf %116 : vector<8x128xf32>
    %118 = math.exp %117 : vector<8x128xf32>
    %cst_33 = arith.constant 1.000000e+00 : f32
    %119 = vector.broadcast %cst_33 : f32 to vector<8x128xf32>
    %120 = arith.addf %119, %118 : vector<8x128xf32>
    %121 = arith.divf %119, %120 : vector<8x128xf32>
    %122 = vector.extract_strided_slice %109 {offsets = [0, 256], sizes = [8, 128], strides = [1, 1]} : vector<8x512xf32> to vector<8x128xf32>
    %123 = math.tanh %122 : vector<8x128xf32>
    %124 = vector.extract_strided_slice %109 {offsets = [0, 384], sizes = [8, 128], strides = [1, 1]} : vector<8x512xf32> to vector<8x128xf32>
    %125 = arith.negf %124 : vector<8x128xf32>
    %126 = math.exp %125 : vector<8x128xf32>
    %cst_34 = arith.constant 1.000000e+00 : f32
    %127 = vector.broadcast %cst_34 : f32 to vector<8x128xf32>
    %128 = arith.addf %127, %126 : vector<8x128xf32>
    %129 = arith.divf %127, %128 : vector<8x128xf32>
    %130 = arith.mulf %121, %101 : vector<8x128xf32>
    %131 = arith.mulf %115, %123 : vector<8x128xf32>
    %132 = arith.addf %130, %131 : vector<8x128xf32>
    %133 = math.tanh %132 : vector<8x128xf32>
    %134 = arith.mulf %129, %133 : vector<8x128xf32>
    %c4_i32 = arith.constant 4 : i32
    %c8_i32_35 = arith.constant 8 : i32
    %135 = arith.muli %c4_i32, %c8_i32_35 : i32
    %136 = tpu.assume_multiple %135, 8 : i32
    %137 = arith.index_cast %136 : i32 to index
    %c0_36 = arith.constant 0 : index
    %138 = vector.load %arg9[%137, %c0_36] : memref<64x512xf32, #tpu.memory_space<vmem>>, vector<8x512xf32>
    %cst_37 = arith.constant dense<0.000000e+00> : vector<8x512xf32>
    %139 = tpu.matmul %134, %8, %cst_37 {dimension_numbers = #tpu.dot_dimension_numbers<[1], [0], [0], [1], [0, 0, 1, 1], [], []>} : vector<8x128xf32>, vector<128x512xf32>, vector<8x512xf32> -> vector<8x512xf32>
    %140 = arith.addf %138, %139 : vector<8x512xf32>
    %141 = vector.extract_strided_slice %140 {offsets = [0, 0], sizes = [8, 128], strides = [1, 1]} : vector<8x512xf32> to vector<8x128xf32>
    %142 = arith.negf %141 : vector<8x128xf32>
    %143 = math.exp %142 : vector<8x128xf32>
    %cst_38 = arith.constant 1.000000e+00 : f32
    %144 = vector.broadcast %cst_38 : f32 to vector<8x128xf32>
    %145 = arith.addf %144, %143 : vector<8x128xf32>
    %146 = arith.divf %144, %145 : vector<8x128xf32>
    %147 = vector.extract_strided_slice %140 {offsets = [0, 128], sizes = [8, 128], strides = [1, 1]} : vector<8x512xf32> to vector<8x128xf32>
    %148 = arith.negf %147 : vector<8x128xf32>
    %149 = math.exp %148 : vector<8x128xf32>
    %cst_39 = arith.constant 1.000000e+00 : f32
    %150 = vector.broadcast %cst_39 : f32 to vector<8x128xf32>
    %151 = arith.addf %150, %149 : vector<8x128xf32>
    %152 = arith.divf %150, %151 : vector<8x128xf32>
    %153 = vector.extract_strided_slice %140 {offsets = [0, 256], sizes = [8, 128], strides = [1, 1]} : vector<8x512xf32> to vector<8x128xf32>
    %154 = math.tanh %153 : vector<8x128xf32>
    %155 = vector.extract_strided_slice %140 {offsets = [0, 384], sizes = [8, 128], strides = [1, 1]} : vector<8x512xf32> to vector<8x128xf32>
    %156 = arith.negf %155 : vector<8x128xf32>
    %157 = math.exp %156 : vector<8x128xf32>
    %cst_40 = arith.constant 1.000000e+00 : f32
    %158 = vector.broadcast %cst_40 : f32 to vector<8x128xf32>
    %159 = arith.addf %158, %157 : vector<8x128xf32>
    %160 = arith.divf %158, %159 : vector<8x128xf32>
    %161 = arith.mulf %152, %132 : vector<8x128xf32>
    %162 = arith.mulf %146, %154 : vector<8x128xf32>
    %163 = arith.addf %161, %162 : vector<8x128xf32>
    %164 = math.tanh %163 : vector<8x128xf32>
    %165 = arith.mulf %160, %164 : vector<8x128xf32>
    %c5_i32 = arith.constant 5 : i32
    %c8_i32_41 = arith.constant 8 : i32
    %166 = arith.muli %c5_i32, %c8_i32_41 : i32
    %167 = tpu.assume_multiple %166, 8 : i32
    %168 = arith.index_cast %167 : i32 to index
    %c0_42 = arith.constant 0 : index
    %169 = vector.load %arg9[%168, %c0_42] : memref<64x512xf32, #tpu.memory_space<vmem>>, vector<8x512xf32>
    %cst_43 = arith.constant dense<0.000000e+00> : vector<8x512xf32>
    %170 = tpu.matmul %165, %8, %cst_43 {dimension_numbers = #tpu.dot_dimension_numbers<[1], [0], [0], [1], [0, 0, 1, 1], [], []>} : vector<8x128xf32>, vector<128x512xf32>, vector<8x512xf32> -> vector<8x512xf32>
    %171 = arith.addf %169, %170 : vector<8x512xf32>
    %172 = vector.extract_strided_slice %171 {offsets = [0, 0], sizes = [8, 128], strides = [1, 1]} : vector<8x512xf32> to vector<8x128xf32>
    %173 = arith.negf %172 : vector<8x128xf32>
    %174 = math.exp %173 : vector<8x128xf32>
    %cst_44 = arith.constant 1.000000e+00 : f32
    %175 = vector.broadcast %cst_44 : f32 to vector<8x128xf32>
    %176 = arith.addf %175, %174 : vector<8x128xf32>
    %177 = arith.divf %175, %176 : vector<8x128xf32>
    %178 = vector.extract_strided_slice %171 {offsets = [0, 128], sizes = [8, 128], strides = [1, 1]} : vector<8x512xf32> to vector<8x128xf32>
    %179 = arith.negf %178 : vector<8x128xf32>
    %180 = math.exp %179 : vector<8x128xf32>
    %cst_45 = arith.constant 1.000000e+00 : f32
    %181 = vector.broadcast %cst_45 : f32 to vector<8x128xf32>
    %182 = arith.addf %181, %180 : vector<8x128xf32>
    %183 = arith.divf %181, %182 : vector<8x128xf32>
    %184 = vector.extract_strided_slice %171 {offsets = [0, 256], sizes = [8, 128], strides = [1, 1]} : vector<8x512xf32> to vector<8x128xf32>
    %185 = math.tanh %184 : vector<8x128xf32>
    %186 = vector.extract_strided_slice %171 {offsets = [0, 384], sizes = [8, 128], strides = [1, 1]} : vector<8x512xf32> to vector<8x128xf32>
    %187 = arith.negf %186 : vector<8x128xf32>
    %188 = math.exp %187 : vector<8x128xf32>
    %cst_46 = arith.constant 1.000000e+00 : f32
    %189 = vector.broadcast %cst_46 : f32 to vector<8x128xf32>
    %190 = arith.addf %189, %188 : vector<8x128xf32>
    %191 = arith.divf %189, %190 : vector<8x128xf32>
    %192 = arith.mulf %183, %163 : vector<8x128xf32>
    %193 = arith.mulf %177, %185 : vector<8x128xf32>
    %194 = arith.addf %192, %193 : vector<8x128xf32>
    %195 = math.tanh %194 : vector<8x128xf32>
    %196 = arith.mulf %191, %195 : vector<8x128xf32>
    %c6_i32 = arith.constant 6 : i32
    %c8_i32_47 = arith.constant 8 : i32
    %197 = arith.muli %c6_i32, %c8_i32_47 : i32
    %198 = tpu.assume_multiple %197, 8 : i32
    %199 = arith.index_cast %198 : i32 to index
    %c0_48 = arith.constant 0 : index
    %200 = vector.load %arg9[%199, %c0_48] : memref<64x512xf32, #tpu.memory_space<vmem>>, vector<8x512xf32>
    %cst_49 = arith.constant dense<0.000000e+00> : vector<8x512xf32>
    %201 = tpu.matmul %196, %8, %cst_49 {dimension_numbers = #tpu.dot_dimension_numbers<[1], [0], [0], [1], [0, 0, 1, 1], [], []>} : vector<8x128xf32>, vector<128x512xf32>, vector<8x512xf32> -> vector<8x512xf32>
    %202 = arith.addf %200, %201 : vector<8x512xf32>
    %203 = vector.extract_strided_slice %202 {offsets = [0, 0], sizes = [8, 128], strides = [1, 1]} : vector<8x512xf32> to vector<8x128xf32>
    %204 = arith.negf %203 : vector<8x128xf32>
    %205 = math.exp %204 : vector<8x128xf32>
    %cst_50 = arith.constant 1.000000e+00 : f32
    %206 = vector.broadcast %cst_50 : f32 to vector<8x128xf32>
    %207 = arith.addf %206, %205 : vector<8x128xf32>
    %208 = arith.divf %206, %207 : vector<8x128xf32>
    %209 = vector.extract_strided_slice %202 {offsets = [0, 128], sizes = [8, 128], strides = [1, 1]} : vector<8x512xf32> to vector<8x128xf32>
    %210 = arith.negf %209 : vector<8x128xf32>
    %211 = math.exp %210 : vector<8x128xf32>
    %cst_51 = arith.constant 1.000000e+00 : f32
    %212 = vector.broadcast %cst_51 : f32 to vector<8x128xf32>
    %213 = arith.addf %212, %211 : vector<8x128xf32>
    %214 = arith.divf %212, %213 : vector<8x128xf32>
    %215 = vector.extract_strided_slice %202 {offsets = [0, 256], sizes = [8, 128], strides = [1, 1]} : vector<8x512xf32> to vector<8x128xf32>
    %216 = math.tanh %215 : vector<8x128xf32>
    %217 = vector.extract_strided_slice %202 {offsets = [0, 384], sizes = [8, 128], strides = [1, 1]} : vector<8x512xf32> to vector<8x128xf32>
    %218 = arith.negf %217 : vector<8x128xf32>
    %219 = math.exp %218 : vector<8x128xf32>
    %cst_52 = arith.constant 1.000000e+00 : f32
    %220 = vector.broadcast %cst_52 : f32 to vector<8x128xf32>
    %221 = arith.addf %220, %219 : vector<8x128xf32>
    %222 = arith.divf %220, %221 : vector<8x128xf32>
    %223 = arith.mulf %214, %194 : vector<8x128xf32>
    %224 = arith.mulf %208, %216 : vector<8x128xf32>
    %225 = arith.addf %223, %224 : vector<8x128xf32>
    %226 = math.tanh %225 : vector<8x128xf32>
    %227 = arith.mulf %222, %226 : vector<8x128xf32>
    %c7_i32 = arith.constant 7 : i32
    %c8_i32_53 = arith.constant 8 : i32
    %228 = arith.muli %c7_i32, %c8_i32_53 : i32
    %229 = tpu.assume_multiple %228, 8 : i32
    %230 = arith.index_cast %229 : i32 to index
    %c0_54 = arith.constant 0 : index
    %231 = vector.load %arg9[%230, %c0_54] : memref<64x512xf32, #tpu.memory_space<vmem>>, vector<8x512xf32>
    %cst_55 = arith.constant dense<0.000000e+00> : vector<8x512xf32>
    %232 = tpu.matmul %227, %8, %cst_55 {dimension_numbers = #tpu.dot_dimension_numbers<[1], [0], [0], [1], [0, 0, 1, 1], [], []>} : vector<8x128xf32>, vector<128x512xf32>, vector<8x512xf32> -> vector<8x512xf32>
    %233 = arith.addf %231, %232 : vector<8x512xf32>
    %234 = vector.extract_strided_slice %233 {offsets = [0, 0], sizes = [8, 128], strides = [1, 1]} : vector<8x512xf32> to vector<8x128xf32>
    %235 = arith.negf %234 : vector<8x128xf32>
    %236 = math.exp %235 : vector<8x128xf32>
    %cst_56 = arith.constant 1.000000e+00 : f32
    %237 = vector.broadcast %cst_56 : f32 to vector<8x128xf32>
    %238 = arith.addf %237, %236 : vector<8x128xf32>
    %239 = arith.divf %237, %238 : vector<8x128xf32>
    %240 = vector.extract_strided_slice %233 {offsets = [0, 128], sizes = [8, 128], strides = [1, 1]} : vector<8x512xf32> to vector<8x128xf32>
    %241 = arith.negf %240 : vector<8x128xf32>
    %242 = math.exp %241 : vector<8x128xf32>
    %cst_57 = arith.constant 1.000000e+00 : f32
    %243 = vector.broadcast %cst_57 : f32 to vector<8x128xf32>
    %244 = arith.addf %243, %242 : vector<8x128xf32>
    %245 = arith.divf %243, %244 : vector<8x128xf32>
    %246 = vector.extract_strided_slice %233 {offsets = [0, 256], sizes = [8, 128], strides = [1, 1]} : vector<8x512xf32> to vector<8x128xf32>
    %247 = math.tanh %246 : vector<8x128xf32>
    %248 = vector.extract_strided_slice %233 {offsets = [0, 384], sizes = [8, 128], strides = [1, 1]} : vector<8x512xf32> to vector<8x128xf32>
    %249 = arith.negf %248 : vector<8x128xf32>
    %250 = math.exp %249 : vector<8x128xf32>
    %cst_58 = arith.constant 1.000000e+00 : f32
    %251 = vector.broadcast %cst_58 : f32 to vector<8x128xf32>
    %252 = arith.addf %251, %250 : vector<8x128xf32>
    %253 = arith.divf %251, %252 : vector<8x128xf32>
    %254 = arith.mulf %245, %225 : vector<8x128xf32>
    %255 = arith.mulf %239, %247 : vector<8x128xf32>
    %256 = arith.addf %254, %255 : vector<8x128xf32>
    %257 = math.tanh %256 : vector<8x128xf32>
    %258 = arith.mulf %253, %257 : vector<8x128xf32>
    %c8_i32_59 = arith.constant 8 : i32
    %c0_60 = arith.constant 0 : index
    %c0_61 = arith.constant 0 : index
    %259 = vector.load %arg5[%c0_60, %c0_61] : memref<128x128xf32, #tpu.memory_space<vmem>>, vector<128x128xf32>
    %cst_62 = arith.constant dense<0.000000e+00> : vector<8x128xf32>
    %260 = tpu.matmul %258, %259, %cst_62 {dimension_numbers = #tpu.dot_dimension_numbers<[1], [0], [0], [1], [0, 0, 1, 1], [], []>} : vector<8x128xf32>, vector<128x128xf32>, vector<8x128xf32> -> vector<8x128xf32>
    %c0_63 = arith.constant 0 : index
    %c0_64 = arith.constant 0 : index
    %261 = vector.load %arg6[%c0_63, %c0_64] : memref<1x128xf32, #tpu.memory_space<vmem>>, vector<1x128xf32>
    %262 = vector.broadcast %261 : vector<1x128xf32> to vector<8x128xf32>
    %263 = arith.addf %260, %262 : vector<8x128xf32>
    %264 = arith.negf %263 : vector<8x128xf32>
    %265 = math.exp %264 : vector<8x128xf32>
    %cst_65 = arith.constant 1.000000e+00 : f32
    %266 = vector.broadcast %cst_65 : f32 to vector<8x128xf32>
    %267 = arith.addf %266, %265 : vector<8x128xf32>
    %268 = arith.divf %266, %267 : vector<8x128xf32>
    %c0_66 = arith.constant 0 : index
    %c0_67 = arith.constant 0 : index
    %269 = vector.load %arg7[%c0_66, %c0_67] : memref<8x128xf32, #tpu.memory_space<vmem>>, vector<8x128xf32>
    tpu.vector_store %arg7[%c0_66, %c0_67], %268 {strides = array<i32>} : memref<8x128xf32, #tpu.memory_space<vmem>>, vector<8x128xf32>,
    %c0_68 = arith.constant 0 : index
    %c0_69 = arith.constant 0 : index
    %270 = vector.load %arg8[%c0_68, %c0_69] : memref<8x128xf32, #tpu.memory_space<vmem>>, vector<8x128xf32>
    tpu.vector_store %arg8[%c0_68, %c0_69], %258 {strides = array<i32>} : memref<8x128xf32, #tpu.memory_space<vmem>>, vector<8x128xf32>,
    return
  }
  func.func @transform_0(%arg0: i32) -> (i32, i32, i32) {
    %c0_i32 = arith.constant 0 : i32
    %c0_i32_0 = arith.constant 0 : i32
    %c0_i32_1 = arith.constant 0 : i32
    %c0_i32_2 = arith.constant 0 : i32
    return %c0_i32, %c0_i32_0, %c0_i32_1 : i32, i32, i32
  }
  func.func @transform_1(%arg0: i32) -> (i32, i32) {
    %c0_i32 = arith.constant 0 : i32
    %c0_i32_0 = arith.constant 0 : i32
    %c0_i32_1 = arith.constant 0 : i32
    return %c0_i32, %c0_i32_0 : i32, i32
  }
  func.func @transform_2(%arg0: i32) -> (i32, i32) {
    %c0_i32 = arith.constant 0 : i32
    %c0_i32_0 = arith.constant 0 : i32
    %c0_i32_1 = arith.constant 0 : i32
    return %c0_i32, %c0_i32_0 : i32, i32
  }
  func.func @transform_3(%arg0: i32) -> (i32, i32) {
    %c0_i32 = arith.constant 0 : i32
    %c0_i32_0 = arith.constant 0 : i32
    %c0_i32_1 = arith.constant 0 : i32
    return %c0_i32, %c0_i32_0 : i32, i32
  }
  func.func @transform_4(%arg0: i32) -> (i32, i32) {
    %c0_i32 = arith.constant 0 : i32
    %c0_i32_0 = arith.constant 0 : i32
    %c0_i32_1 = arith.constant 0 : i32
    return %c0_i32, %c0_i32_0 : i32, i32
  }
  func.func @transform_5(%arg0: i32) -> (i32, i32) {
    %c0_i32 = arith.constant 0 : i32
    %c0_i32_0 = arith.constant 0 : i32
    %c0_i32_1 = arith.constant 0 : i32
    return %c0_i32, %c0_i32_0 : i32, i32
  }
  func.func @transform_6(%arg0: i32) -> (i32, i32) {
    %c0_i32 = arith.constant 0 : i32
    %c0_i32_0 = arith.constant 0 : i32
    %c0_i32_1 = arith.constant 0 : i32
    return %c0_i32, %c0_i32_0 : i32, i32
  }
  func.func @transform_7(%arg0: i32) -> (i32, i32) {
    %c0_i32 = arith.constant 0 : i32
    %c0_i32_0 = arith.constant 0 : i32
    %c0_i32_1 = arith.constant 0 : i32
    return %c0_i32, %c0_i32_0 : i32, i32
  }
}

</mosaic_0001>

<bundles_post_ra>
// kernel: tpu_custom_call.1
= control target key start
LH: loop header
LB: loop body
LE: loop exit
PB: predicated region body
PF: predicated region fallthrough
CT: control target
= control target key end

     0   :  { %13 = vsyncpa [#allocation4], 0  ;;  %s3655_s0 = inlined_call_operand.hbm [shape: f32[8,8,128], index: 0, kind: input, shape index: {}]   ;;  %s3656_s1 = inlined_call_operand.hbm [shape: f32[128,512], index: 1, kind: input, shape index: {}]   ;;  %s3657_s2 = inlined_call_operand.hbm [shape: f32[128,512], index: 2, kind: input, shape index: {}]   ;;  %s3658_s3 = inlined_call_operand.vmem [shape: f32[1,512], index: 3, kind: input, shape index: {}]   ;;  %s3659_s4 = inlined_call_operand.hbm [shape: f32[128,128], index: 4, kind: input, shape index: {}]   ;;  %s3660_s5 = inlined_call_operand.vmem [shape: f32[1,128], index: 5, kind: input, shape index: {}]   ;;  %s3661_s6 = inlined_call_operand.hbm [shape: f32[8,128], index: 6, kind: output, shape index: {0}]   ;;  %s3662_s7 = inlined_call_operand.hbm [shape: f32[8,128], index: 7, kind: output, shape index: {1}]  }
   0x1   :  { %14 = vsyncpa [#allocation7], 0 }
   0x2   :  { %15 = vsyncpa [#allocation10], 0 }
   0x3   :  { %16 = vsyncpa [#allocation5], 0 }
   0x4   :  { %17 = vsyncpa [#allocation13], 0  ;;  %s3082_s24 = smov [#allocation6]   ;;  %s2940_s28 = scalar_lea.hbm %s3656_s1, 8192 }
   0x5   :  { %s35_s25 = sshll.u32 %s3082_s24, 4  ;;  %p2941_p0 = scmp.ne.s32.totalorder %s3656_s1, %s2940_s28  ;;  %s36_s25 = int_to_ptr.vmem [resolvable:$true] %s35_s25 }
   0x6   :  { %p2944_p1 = scmp.lt.u32.totalorder %s2940_s28, %s3656_s1 }
   0x8   :  { %p2946_p2 = pnand %p2944_p1, %p2941_p0 }
   0xa   :  { %2949 = shalt.err (!%p2946_p2)
}
   0xb   :  { %s2950_s10 = scalar_lea.vmem %s36_s25, 8192  ;;  %p2955_p4 = scmp.lt.s32.totalorder %s36_s25, %s36_s25 }
   0xc   :  { %p2951_p3 = scmp.ne.s32.totalorder %s36_s25, %s2950_s10  ;;  %p2956_p5 = scmp.lt.s32.totalorder %s2950_s10, %s2950_s10 }
   0xe   :  { %p2957_p6 = por %p2956_p5, %p2955_p4 }
  0x10   :  { %p2958_p7 = pnand %p2957_p6, %p2951_p3 }
  0x12   :  { %2961 = shalt.err (!%p2958_p7)
}
  0x13   :  { %s3083_s11 = smov 512   ;;  %s3084_s12 = smov 32  }
  0x14   :  { %41 = dma.hbm_to_vmem [thread:$0]  %s3656_s1, 8192, %s36_s25, [#allocation7], %s3083_s11, %s3083_s11, %s3084_s12  }
  0x15   :  { %s3085_s15 = smov [#allocation3]   ;;  %s2962_s19 = scalar_lea.hbm %s3655_s0, 1024 }
  0x16   :  { %s23_s16 = sshll.u32 %s3085_s15, 4  ;;  %p2963_p8 = scmp.ne.s32.totalorder %s3655_s0, %s2962_s19  ;;  %s24_s16 = int_to_ptr.vmem [resolvable:$true] %s23_s16 }
  0x17   :  { %p2966_p9 = scmp.lt.u32.totalorder %s2962_s19, %s3655_s0 }
  0x19   :  { %p2968_p10 = pnand %p2966_p9, %p2963_p8 }
  0x1b   :  { %2971 = shalt.err (!%p2968_p10)
}
  0x1c   :  { %s2972_s24 = scalar_lea.vmem %s24_s16, 1024  ;;  %p2977_p12 = scmp.lt.s32.totalorder %s24_s16, %s24_s16 }
  0x1d   :  { %p2973_p11 = scmp.ne.s32.totalorder %s24_s16, %s2972_s24  ;;  %p2978_p13 = scmp.lt.s32.totalorder %s2972_s24, %s2972_s24 }
  0x1f   :  { %p2979_p0 = por %p2978_p13, %p2977_p12 }
  0x21   :  { %p2980_p1 = pnand %p2979_p0, %p2973_p11 }
  0x23   :  { %2983 = shalt.err (!%p2980_p1)
}
  0x24   :  { %s3086_s1 = smov 128   ;;  %s3087_s25 = smov 8  }
  0x25   :  { %29 = dma.hbm_to_vmem [thread:$0]  %s3655_s0, 1024, %s24_s16, [#allocation4], %s3086_s1, %s3086_s1, %s3087_s25  }
  0x26   :  { %s3088_s28 = smov [#allocation8]   ;;  %s3089_s30 = smov [#allocation9]  }
  0x27   :  { %s47_s29 = sshll.u32 %s3088_s28, 4  ;;  %s61_s8 = sshll.u32 %s3089_s30, 4  ;;  %s48_s29 = int_to_ptr.vmem [resolvable:$true] %s47_s29  ;;  %s3165_s8 = int_to_ptr.vmem [resolvable:$true] %s61_s8 }
  0x28   :  { %s2984_s13 = scalar_lea.hbm %s3657_s2, 8192 }
  0x29   :  { %p2985_p2 = scmp.ne.s32.totalorder %s3657_s2, %s2984_s13  ;;  %p2988_p3 = scmp.lt.u32.totalorder %s2984_s13, %s3657_s2 }
  0x2b   :  { %p2990_p4 = pnand %p2988_p3, %p2985_p2 }
  0x2d   :  { %2993 = shalt.err (!%p2990_p4)
}
  0x2e   :  { %s2994_s0 = scalar_lea.vmem %s48_s29, 8192  ;;  %p2999_p6 = scmp.lt.s32.totalorder %s48_s29, %s48_s29 }
  0x2f   :  { %p2995_p5 = scmp.ne.s32.totalorder %s48_s29, %s2994_s0  ;;  %p3000_p7 = scmp.lt.s32.totalorder %s2994_s0, %s2994_s0 }
  0x31   :  { %p3001_p8 = por %p3000_p7, %p2999_p6 }
  0x33   :  { %p3002_p9 = pnand %p3001_p8, %p2995_p5 }
  0x35   :  { %3005 = shalt.err (!%p3002_p9)
}
  0x36   :  { %53 = dma.hbm_to_vmem [thread:$0]  %s3657_s2, 8192, %s48_s29, [#allocation7], %s3083_s11, %s3083_s11, %s3084_s12  }
  0x37   :  { %s3006_s22 = scalar_lea.hbm %s3659_s4, 2048 }
  0x38   :  { %p3007_p10 = scmp.ne.s32.totalorder %s3659_s4, %s3006_s22  ;;  %p3010_p11 = scmp.lt.u32.totalorder %s3006_s22, %s3659_s4 }
  0x3a   :  { %p3012_p12 = pnand %p3010_p11, %p3007_p10 }
  0x3c   :  { %3015 = shalt.err (!%p3012_p12)
}
  0x3d   :  { %s3016_s28 = scalar_lea.vmem %s3165_s8, 2048  ;;  %p3021_p0 = scmp.lt.s32.totalorder %s3165_s8, %s3165_s8 }
  0x3e   :  { %p3017_p13 = scmp.ne.s32.totalorder %s3165_s8, %s3016_s28  ;;  %p3022_p1 = scmp.lt.s32.totalorder %s3016_s28, %s3016_s28 }
  0x40   :  { %p3023_p2 = por %p3022_p1, %p3021_p0 }
  0x42   :  { %p3024_p3 = pnand %p3023_p2, %p3017_p13 }
  0x44   :  { %3027 = shalt.err (!%p3024_p3)
}
  0x45   :  { %67 = dma.hbm_to_vmem [thread:$0]  %s3659_s4, 2048, %s3165_s8, [#allocation10], %s3086_s1, %s3086_s1, %s3087_s25  }
  0x46   :  { %3072 = dma.done.wait [#allocation4], 1024  }
  0x47   :  { %3073 = vsyncadd [#allocation4], 4294966272 }
  0x48   :  { %3074 = dma.done.wait [#allocation7], 16384  }
  0x49   :  { %3075 = vsyncadd [#allocation7], 4294950912 }
  0x4a   :  { %3076 = dma.done.wait [#allocation10], 2048  }
  0x4b   :  { %3077 = vsyncadd [#allocation10], 4294965248  ;;  %v3090_v0 = vmov 0.0   ;;  %v91_v1 = vld [vmem:[#allocation6 + $0x8] sm:$0xff]  ;;  %v93_v3 = vld [vmem:[#allocation6 + $0x18] sm:$0xff]  ;;  %vm3092_vm0 = vmmov 0  }
  0x4c   :  { %240 = vmatprep.mubr.f32.mxu0 %v3090_v0  ;;  %353 = vmatprep.mubr.f32.mxu1 %v3090_v0  ;;  %v95_v2 = vld [vmem:[#allocation6 + $0x28] sm:$0xff]  ;;  %v97_v5 = vld [vmem:[#allocation6 + $0x38] sm:$0xff]  ;;  %v90_v6 = vld [vmem:[#allocation6] sm:$0xff] }
  0x4d   :  { %v2131_v4 = vpack.c.bf16 %v95_v2, %v91_v1  ;;  %v94_v7 = vld [vmem:[#allocation6 + $0x20] sm:$0xff]  ;;  %v2163_v8 = vpack.c.bf16 %v97_v5, %v93_v3  ;;  %v92_v10 = vld [vmem:[#allocation6 + $0x10] sm:$0xff]  ;;  %v99_v12 = vld [vmem:[#allocation6 + $0x48] sm:$0xff] }
  0x4e   :  { %v2133_v9 = vpack.c.bf16 %v94_v7, %v90_v6  ;;  %v96_v11 = vld [vmem:[#allocation6 + $0x30] sm:$0xff]  ;;  %v103_v14 = vld [vmem:[#allocation6 + $0x68] sm:$0xff]  ;;  %v101_v15 = vld [vmem:[#allocation6 + $0x58] sm:$0xff] }
  0x4f   :  { %2132 = vmatprep.subr.bf16.mxu0 %v2131_v4  ;;  %v2165_v13 = vpack.c.bf16 %v96_v11, %v92_v10  ;;  %v105_v16 = vld [vmem:[#allocation6 + $0x78] sm:$0xff]  ;;  %2164 = vmatprep.subr.bf16.mxu1 %v2163_v8  ;;  %v2135_v17 = vpack.c.bf16 %v103_v14, %v99_v12  ;;  %v98_v19 = vld [vmem:[#allocation6 + $0x40] sm:$0xff]  ;;  %v100_v21 = vld [vmem:[#allocation6 + $0x50] sm:$0xff] }
  0x50   :  { %2134 = vmatpush1.bf16.msra.mxu0 %v2133_v9  ;;  %v2167_v18 = vpack.c.bf16 %v105_v16, %v101_v15  ;;  %v102_v20 = vld [vmem:[#allocation6 + $0x60] sm:$0xff]  ;;  %v104_v23 = vld [vmem:[#allocation6 + $0x70] sm:$0xff]  ;;  %v107_v24 = vld [vmem:[#allocation6 + $0x88] sm:$0xff] }
  0x51   :  { %2166 = vmatpush1.bf16.msra.mxu1 %v2165_v13  ;;  %v2137_v22 = vpack.c.bf16 %v102_v20, %v98_v19  ;;  %v111_v25 = vld [vmem:[#allocation6 + $0xa8] sm:$0xff]  ;;  %2136 = vmatprep.subr.bf16.mxu0 %v2135_v17  ;;  %v2169_v26 = vpack.c.bf16 %v104_v23, %v100_v21  ;;  %v109_v28 = vld [vmem:[#allocation6 + $0x98] sm:$0xff]  ;;  %v106_v30 = vld [vmem:[#allocation6 + $0x80] sm:$0xff] }
  0x52   :  { %2168 = vmatprep.subr.bf16.mxu1 %v2167_v18  ;;  %v2139_v27 = vpack.c.bf16 %v111_v25, %v107_v24  ;;  %v113_v29 = vld [vmem:[#allocation6 + $0xb8] sm:$0xff]  ;;  %v110_v32 = vld [vmem:[#allocation6 + $0xa0] sm:$0xff]  ;;  %v108_v33 = vld [vmem:[#allocation6 + $0x90] sm:$0xff] }
  0x53   :  { %v2171_v31 = vpack.c.bf16 %v113_v29, %v109_v28  ;;  %v112_v34 = vld [vmem:[#allocation6 + $0xb0] sm:$0xff]  ;;  %v2141_v35 = vpack.c.bf16 %v110_v32, %v106_v30  ;;  %v115_v36 = vld [vmem:[#allocation6 + $0xc8] sm:$0xff]  ;;  %v117_v38 = vld [vmem:[#allocation6 + $0xd8] sm:$0xff] }
  0x54   :  { %2138 = vmatpush1.bf16.msra.mxu0 %v2137_v22  ;;  %v119_v37 = vld [vmem:[#allocation6 + $0xe8] sm:$0xff]  ;;  %v2173_v39 = vpack.c.bf16 %v112_v34, %v108_v33  ;;  %v121_v41 = vld [vmem:[#allocation6 + $0xf8] sm:$0xff]  ;;  %v114_v42 = vld [vmem:[#allocation6 + $0xc0] sm:$0xff] }
  0x55   :  { %2170 = vmatpush1.bf16.msra.mxu1 %v2169_v26  ;;  %2140 = vmatprep.subr.bf16.mxu0 %v2139_v27  ;;  %v2143_v40 = vpack.c.bf16 %v119_v37, %v115_v36  ;;  %v118_v43 = vld [vmem:[#allocation6 + $0xe0] sm:$0xff]  ;;  %v2175_v44 = vpack.c.bf16 %v121_v41, %v117_v38  ;;  %v116_v45 = vld [vmem:[#allocation6 + $0xd0] sm:$0xff]  ;;  %v123_v47 = vld [vmem:[#allocation6 + $0x108] sm:$0xff] }
  0x56   :  { %2172 = vmatprep.subr.bf16.mxu1 %v2171_v31  ;;  %v120_v46 = vld [vmem:[#allocation6 + $0xf0] sm:$0xff]  ;;  %v127_v48 = vld [vmem:[#allocation6 + $0x128] sm:$0xff]  ;;  %v125_v49 = vld [vmem:[#allocation6 + $0x118] sm:$0xff]  ;;  %v2145_v51 = vpack.c.bf16 %v118_v43, %v114_v42 }
  0x57   :  { %v129_v50 = vld [vmem:[#allocation6 + $0x138] sm:$0xff]  ;;  %v2177_v52 = vpack.c.bf16 %v120_v46, %v116_v45  ;;  %v2147_v53 = vpack.c.bf16 %v127_v48, %v123_v47  ;;  %v122_v54 = vld [vmem:[#allocation6 + $0x100] sm:$0xff]  ;;  %v124_v56 = vld [vmem:[#allocation6 + $0x110] sm:$0xff] }
  0x58   :  { %2142 = vmatpush1.bf16.msra.mxu0 %v2141_v35  ;;  %v126_v55 = vld [vmem:[#allocation6 + $0x120] sm:$0xff]  ;;  %v2179_v57 = vpack.c.bf16 %v129_v50, %v125_v49  ;;  %v128_v58 = vld [vmem:[#allocation6 + $0x130] sm:$0xff]  ;;  %v131_v59 = vld [vmem:[#allocation6 + $0x148] sm:$0xff] }
  0x59   :  { %2174 = vmatpush1.bf16.msra.mxu1 %v2173_v39  ;;  %2144 = vmatprep.subr.bf16.mxu0 %v2143_v40  ;;  %v135_v60 = vld [vmem:[#allocation6 + $0x168] sm:$0xff]  ;;  %v133_v61 = vld [vmem:[#allocation6 + $0x158] sm:$0xff]  ;;  %v2149_v63 = vpack.c.bf16 %v126_v55, %v122_v54  ;;  %v2181_v1 = vpack.c.bf16 %v128_v58, %v124_v56  ;;  %v130_v3 = vld [vmem:[#allocation6 + $0x140] sm:$0xff] }
  0x5a   :  { %2176 = vmatprep.subr.bf16.mxu1 %v2175_v44  ;;  %v137_v62 = vld [vmem:[#allocation6 + $0x178] sm:$0xff]  ;;  %v2151_v2 = vpack.c.bf16 %v135_v60, %v131_v59  ;;  %v134_v4 = vld [vmem:[#allocation6 + $0x160] sm:$0xff]  ;;  %v132_v5 = vld [vmem:[#allocation6 + $0x150] sm:$0xff] }
  0x5b   :  { %v2183_v6 = vpack.c.bf16 %v137_v62, %v133_v61  ;;  %v136_v7 = vld [vmem:[#allocation6 + $0x170] sm:$0xff]  ;;  %v139_v8 = vld [vmem:[#allocation6 + $0x188] sm:$0xff]  ;;  %v141_v10 = vld [vmem:[#allocation6 + $0x198] sm:$0xff]  ;;  %v2153_v12 = vpack.c.bf16 %v134_v4, %v130_v3 }
  0x5c   :  { %2146 = vmatpush1.bf16.msra.mxu0 %v2145_v51  ;;  %v143_v9 = vld [vmem:[#allocation6 + $0x1a8] sm:$0xff]  ;;  %v145_v11 = vld [vmem:[#allocation6 + $0x1b8] sm:$0xff]  ;;  %v2185_v13 = vpack.c.bf16 %v136_v7, %v132_v5  ;;  %v138_v15 = vld [vmem:[#allocation6 + $0x180] sm:$0xff] }
  0x5d   :  { %2178 = vmatpush1.bf16.msra.mxu1 %v2177_v52  ;;  %2148 = vmatprep.subr.bf16.mxu0 %v2147_v53  ;;  %v2155_v14 = vpack.c.bf16 %v143_v9, %v139_v8  ;;  %v142_v16 = vld [vmem:[#allocation6 + $0x1a0] sm:$0xff]  ;;  %v140_v17 = vld [vmem:[#allocation6 + $0x190] sm:$0xff]  ;;  %v2187_v18 = vpack.c.bf16 %v145_v11, %v141_v10  ;;  %v147_v20 = vld [vmem:[#allocation6 + $0x1c8] sm:$0xff] }
  0x5e   :  { %2180 = vmatprep.subr.bf16.mxu1 %v2179_v57  ;;  %v144_v19 = vld [vmem:[#allocation6 + $0x1b0] sm:$0xff]  ;;  %v151_v21 = vld [vmem:[#allocation6 + $0x1e8] sm:$0xff]  ;;  %v149_v22 = vld [vmem:[#allocation6 + $0x1d8] sm:$0xff]  ;;  %v2157_v24 = vpack.c.bf16 %v142_v16, %v138_v15 }
  0x5f   :  { %v153_v23 = vld [vmem:[#allocation6 + $0x1f8] sm:$0xff]  ;;  %v2189_v25 = vpack.c.bf16 %v144_v19, %v140_v17  ;;  %v2159_v26 = vpack.c.bf16 %v151_v21, %v147_v20  ;;  %v146_v27 = vld [vmem:[#allocation6 + $0x1c0] sm:$0xff]  ;;  %v148_v29 = vld [vmem:[#allocation6 + $0x1d0] sm:$0xff] }
  0x60   :  { %2150 = vmatpush1.bf16.msra.mxu0 %v2149_v63  ;;  %v150_v28 = vld [vmem:[#allocation6 + $0x1e0] sm:$0xff]  ;;  %v2191_v30 = vpack.c.bf16 %v153_v23, %v149_v22  ;;  %v152_v31 = vld [vmem:[#allocation6 + $0x1f0] sm:$0xff]  ;;  %v435_v32 = vld [vmem:[#allocation8 + $0x8] sm:$0xff] }
  0x61   :  { %2182 = vmatpush1.bf16.msra.mxu1 %v2181_v1  ;;  %2152 = vmatprep.subr.bf16.mxu0 %v2151_v2  ;;  %v439_v33 = vld [vmem:[#allocation8 + $0x28] sm:$0xff]  ;;  %v437_v34 = vld [vmem:[#allocation8 + $0x18] sm:$0xff]  ;;  %v2161_v36 = vpack.c.bf16 %v150_v28, %v146_v27  ;;  %v2193_v37 = vpack.c.bf16 %v152_v31, %v148_v29  ;;  %v434_v39 = vld [vmem:[#allocation8] sm:$0xff] }
  0x62   :  { %2184 = vmatprep.subr.bf16.mxu1 %v2183_v6  ;;  %v441_v35 = vld [vmem:[#allocation8 + $0x38] sm:$0xff]  ;;  %v3204_v38 = vpack.c.bf16 %v439_v33, %v435_v32  ;;  %v438_v40 = vld [vmem:[#allocation8 + $0x20] sm:$0xff]  ;;  %v436_v42 = vld [vmem:[#allocation8 + $0x10] sm:$0xff] }
  0x63   :  { %v3206_v41 = vpack.c.bf16 %v441_v35, %v437_v34  ;;  %v440_v43 = vld [vmem:[#allocation8 + $0x30] sm:$0xff]  ;;  %v443_v44 = vld [vmem:[#allocation8 + $0x48] sm:$0xff]  ;;  %v82_v46 = vld [vmem:[#allocation3] sm:$0xff]  ;;  %v3208_v47 = vpack.c.bf16 %v438_v40, %v434_v39 }
  0x64   :  { %2154 = vmatpush1.bf16.msra.mxu0 %v2153_v12  ;;  %v447_v45 = vld [vmem:[#allocation8 + $0x68] sm:$0xff]  ;;  %v445_v48 = vld [vmem:[#allocation8 + $0x58] sm:$0xff]  ;;  %v3211_v50 = vpack.c.bf16 %v440_v43, %v436_v42  ;;  %v442_v51 = vld [vmem:[#allocation8 + $0x40] sm:$0xff] }
  0x65   :  { %2186 = vmatpush1.bf16.msra.mxu1 %v2185_v13  ;;  %2156 = vmatprep.subr.bf16.mxu0 %v2155_v14  ;;  %v449_v49 = vld [vmem:[#allocation8 + $0x78] sm:$0xff]  ;;  %v446_v52 = vld [vmem:[#allocation8 + $0x60] sm:$0xff]  ;;  %v3214_v53 = vpack.c.bf16 %v447_v45, %v443_v44  ;;  %v444_v54 = vld [vmem:[#allocation8 + $0x50] sm:$0xff] }
  0x66   :  { %2188 = vmatprep.subr.bf16.mxu1 %v2187_v18  ;;  %v448_v55 = vld [vmem:[#allocation8 + $0x70] sm:$0xff]  ;;  %v3216_v56 = vpack.c.bf16 %v449_v49, %v445_v48  ;;  %v451_v57 = vld [vmem:[#allocation8 + $0x88] sm:$0xff]  ;;  %v3219_v60 = vpack.c.bf16 %v446_v52, %v442_v51  ;;  %v453_v61 = vld [vmem:[#allocation8 + $0x98] sm:$0xff] }
  0x67   :  { %v455_v58 = vld [vmem:[#allocation8 + $0xa8] sm:$0xff]  ;;  %v457_v62 = vld [vmem:[#allocation8 + $0xb8] sm:$0xff]  ;;  %v3223_v63 = vpack.c.bf16 %v448_v55, %v444_v54  ;;  %v450_v1 = vld [vmem:[#allocation8 + $0x80] sm:$0xff] }
  0x68   :  { %2158 = vmatpush1.bf16.msra.mxu0 %v2157_v24  ;;  %v83_v59 = vld [vmem:[#allocation3 + $0x8] sm:$0xff]  ;;  %v454_v2 = vld [vmem:[#allocation8 + $0xa0] sm:$0xff]  ;;  %v3227_v3 = vpack.c.bf16 %v455_v58, %v451_v57  ;;  %v452_v4 = vld [vmem:[#allocation8 + $0x90] sm:$0xff]  ;;  %v3230_v6 = vpack.c.bf16 %v457_v62, %v453_v61 }
  0x69   :  { %2190 = vmatpush1.bf16.msra.mxu1 %v2189_v25  ;;  %2160 = vmatprep.subr.bf16.mxu0 %v2159_v26  ;;  %v456_v5 = vld [vmem:[#allocation8 + $0xb0] sm:$0xff]  ;;  %v459_v7 = vld [vmem:[#allocation8 + $0xc8] sm:$0xff]  ;;  %v3233_v10 = vpack.c.bf16 %v454_v2, %v450_v1  ;;  %v461_v11 = vld [vmem:[#allocation8 + $0xd8] sm:$0xff] }
  0x6a   :  { %2192 = vmatprep.subr.bf16.mxu1 %v2191_v30  ;;  %v463_v8 = vld [vmem:[#allocation8 + $0xe8] sm:$0xff]  ;;  %v84_v9 = vld [vmem:[#allocation3 + $0x10] sm:$0xff]  ;;  %v465_v12 = vld [vmem:[#allocation8 + $0xf8] sm:$0xff]  ;;  %v3237_v13 = vpack.c.bf16 %v456_v5, %v452_v4 }
  0x6b   :  { %v458_v14 = vld [vmem:[#allocation8 + $0xc0] sm:$0xff]  ;;  %v3241_v16 = vpack.c.bf16 %v463_v8, %v459_v7  ;;  %v460_v17 = vld [vmem:[#allocation8 + $0xd0] sm:$0xff]  ;;  %v3244_v19 = vpack.c.bf16 %v465_v12, %v461_v11  ;;  %v467_v20 = vld [vmem:[#allocation8 + $0x108] sm:$0xff] }
  0x6c   :  { %2162 = vmatpush1.bf16.msra.mxu0 %v2161_v36  ;;  %v462_v15 = vld [vmem:[#allocation8 + $0xe0] sm:$0xff]  ;;  %v464_v18 = vld [vmem:[#allocation8 + $0xf0] sm:$0xff]  ;;  %v471_v21 = vld [vmem:[#allocation8 + $0x128] sm:$0xff] }
  0x6d   :  { %2194 = vmatpush1.bf16.msra.mxu1 %v2193_v37  ;;  %2196 = vmatprep.subr.bf16.mxu0 %v3204_v38  ;;  %v85_v22 = vld [vmem:[#allocation3 + $0x18] sm:$0xff]  ;;  %v3247_v23 = vpack.c.bf16 %v462_v15, %v458_v14  ;;  %v3251_v26 = vpack.c.bf16 %v464_v18, %v460_v17  ;;  %v466_v27 = vld [vmem:[#allocation8 + $0x100] sm:$0xff]  ;;  %v3255_v29 = vpack.c.bf16 %v471_v21, %v467_v20  ;;  %v468_v30 = vld [vmem:[#allocation8 + $0x110] sm:$0xff] }
  0x6e   :  { %2228 = vmatprep.subr.bf16.mxu1 %v3206_v41  ;;  %v469_v24 = vld [vmem:[#allocation8 + $0x118] sm:$0xff]  ;;  %v470_v28 = vld [vmem:[#allocation8 + $0x120] sm:$0xff]  ;;  %v472_v31 = vld [vmem:[#allocation8 + $0x130] sm:$0xff] }
  0x6f   :  { %241 = vmatmul.mubr.f32.vlgmr.msra.gmra.mrb[0].mxu0 %v82_v46  ;;  %v473_v25 = vld [vmem:[#allocation8 + $0x138] sm:$0xff]  ;;  %v475_v33 = vld [vmem:[#allocation8 + $0x148] sm:$0xff]  ;;  %v86_v35 = vld [vmem:[#allocation3 + $0x20] sm:$0xff]  ;;  %v3261_v36 = vpack.c.bf16 %v470_v28, %v466_v27  ;;  %v3265_v40 = vpack.c.bf16 %v472_v31, %v468_v30  ;;  %v156_v28 = vlaneseq }
  0x70   :  { %354 = vmatmul.mubr.f32.vlgmr.msra.gmra.mrb[0].mxu1 %v82_v46  ;;  %2198 = vmatpush1.bf16.msra.mxu0 %v3208_v47  ;;  %v3258_v32 = vpack.c.bf16 %v473_v25, %v469_v24  ;;  %v479_v34 = vld [vmem:[#allocation8 + $0x168] sm:$0xff]  ;;  %v477_v37 = vld [vmem:[#allocation8 + $0x158] sm:$0xff]  ;;  %v474_v42 = vld [vmem:[#allocation8 + $0x140] sm:$0xff] }
  0x71   :  { %2230 = vmatpush1.bf16.msra.mxu1 %v3211_v50  ;;  %246 = vmatprep.mubr.f32.mxu0 %v3090_v0  ;;  %v481_v39 = vld [vmem:[#allocation8 + $0x178] sm:$0xff]  ;;  %v478_v43 = vld [vmem:[#allocation8 + $0x160] sm:$0xff]  ;;  %v3269_v44 = vpack.c.bf16 %v479_v34, %v475_v33  ;;  %v476_v45 = vld [vmem:[#allocation8 + $0x150] sm:$0xff]  ;;  %v157_v30 = vshrl.u32 %v156_v28, 7 }
  0x72   :  { %359 = vmatprep.mubr.f32.mxu1 %v3090_v0  ;;  %2200 = vmatprep.subr.bf16.mxu0 %v3214_v53  ;;  %v480_v46 = vld [vmem:[#allocation8 + $0x170] sm:$0xff]  ;;  %v3272_v48 = vpack.c.bf16 %v481_v39, %v477_v37  ;;  %v483_v49 = vld [vmem:[#allocation8 + $0x188] sm:$0xff]  ;;  %v3275_v54 = vpack.c.bf16 %v478_v43, %v474_v42  ;;  %v485_v55 = vld [vmem:[#allocation8 + $0x198] sm:$0xff] }
  0x73   :  { %247 = vmatmul.mubr.f32.gmra.mrb[2].mxu0 %v83_v59  ;;  %2232 = vmatprep.subr.bf16.mxu1 %v3216_v56  ;;  %v487_v51 = vld [vmem:[#allocation8 + $0x1a8] sm:$0xff]  ;;  %v489_v57 = vld [vmem:[#allocation8 + $0x1b8] sm:$0xff]  ;;  %v3279_v58 = vpack.c.bf16 %v480_v46, %v476_v45  ;;  %v486_v61 = vld [vmem:[#allocation8 + $0x1a0] sm:$0xff]  ;;  %v158_v31 = vsub.s32 0, %v157_v30  ;;  %v162_v34 = vsub.s32 1, %v157_v30  ;;  %v170_v42 = vsub.s32 3, %v157_v30 }
  0x74   :  { %360 = vmatmul.mubr.f32.gmra.mrb[2].mxu1 %v83_v59  ;;  %2202 = vmatpush1.bf16.msra.mxu0 %v3219_v60  ;;  %v87_v52 = vld [vmem:[#allocation3 + $0x28] sm:$0xff]  ;;  %v482_v59 = vld [vmem:[#allocation8 + $0x180] sm:$0xff]  ;;  %v3283_v62 = vpack.c.bf16 %v487_v51, %v483_v49  ;;  %v484_v1 = vld [vmem:[#allocation8 + $0x190] sm:$0xff]  ;;  %v3286_v4 = vpack.c.bf16 %v489_v57, %v485_v55 }
  0x75   :  { %2234 = vmatpush1.bf16.msra.mxu1 %v3223_v63  ;;  %252 = vmatprep.mubr.f32.mxu0 %v3090_v0  ;;  %v488_v2 = vld [vmem:[#allocation8 + $0x1b0] sm:$0xff]  ;;  %v491_v5 = vld [vmem:[#allocation8 + $0x1c8] sm:$0xff]  ;;  %v493_v11 = vld [vmem:[#allocation8 + $0x1d8] sm:$0xff] }
  0x76   :  { %365 = vmatprep.mubr.f32.mxu1 %v3090_v0  ;;  %2204 = vmatprep.subr.bf16.mxu0 %v3227_v3  ;;  %v495_v7 = vld [vmem:[#allocation8 + $0x1e8] sm:$0xff]  ;;  %v88_v8 = vld [vmem:[#allocation3 + $0x30] sm:$0xff]  ;;  %v497_v12 = vld [vmem:[#allocation8 + $0x1f8] sm:$0xff]  ;;  %v3293_v14 = vpack.c.bf16 %v488_v2, %v484_v1 }
  0x77   :  { %253 = vmatmul.mubr.f32.gmra.mrb[4].mxu0 %v84_v9  ;;  %2236 = vmatprep.subr.bf16.mxu1 %v3230_v6  ;;  %v490_v15 = vld [vmem:[#allocation8 + $0x1c0] sm:$0xff]  ;;  %v3297_v18 = vpack.c.bf16 %v495_v7, %v491_v5  ;;  %v492_v20 = vld [vmem:[#allocation8 + $0x1d0] sm:$0xff]  ;;  %v89_v24 = vld [vmem:[#allocation3 + $0x38] sm:$0xff] }
  0x78   :  { %366 = vmatmul.mubr.f32.gmra.mrb[4].mxu1 %v84_v9  ;;  %2206 = vmatpush1.bf16.msra.mxu0 %v3233_v10  ;;  %v3289_v9 = vpack.c.bf16 %v486_v61, %v482_v59  ;;  %v494_v17 = vld [vmem:[#allocation8 + $0x1e0] sm:$0xff]  ;;  %v496_v21 = vld [vmem:[#allocation8 + $0x1f0] sm:$0xff]  ;;  %v166_v59 = vsub.s32 2, %v157_v30 }
  0x79   :  { %2238 = vmatpush1.bf16.msra.mxu1 %v3237_v13  ;;  %258 = vmatprep.mubr.f32.mxu0 %v3090_v0  ;;  %v3303_v25 = vpack.c.bf16 %v494_v17, %v490_v15  ;;  %v3307_v27 = vpack.c.bf16 %v496_v21, %v492_v20  ;;  %v154_v33 = vld [vmem:[%s3658_s3] sm:$0xf]  ;;  %s3093_s3 = smov [#allocation12]  }
  0x7a   :  { %371 = vmatprep.mubr.f32.mxu1 %v3090_v0  ;;  %2208 = vmatprep.subr.bf16.mxu0 %v3241_v16  ;;  %v3359_v37 = vrot.slane %v154_v33, %v162_v34  ;;  %v3363_v57 = vrot.slane %v154_v33, %v170_v42  ;;  %v3366_v1 = vrot.slane %v154_v33, %v166_v59  ;;  %s2031_s1 = sshll.u32 %s3093_s3, 4  ;;  %s2032_s1 = int_to_ptr.vmem [resolvable:$true] %s2031_s1 }
  0x7b   :  { %259 = vmatmul.mubr.f32.gmra.mrb[6].mxu0 %v85_v22  ;;  %2240 = vmatprep.subr.bf16.mxu1 %v3244_v19  ;;  %s3028_s25 = scalar_lea.vmem %s2032_s1, 128  ;;  %p3033_p5 = scmp.lt.s32.totalorder %s2032_s1, %s2032_s1 }
  0x7c   :  { %372 = vmatmul.mubr.f32.gmra.mrb[6].mxu1 %v85_v22  ;;  %2210 = vmatpush1.bf16.msra.mxu0 %v3247_v23  ;;  %v3300_v22 = vpack.c.bf16 %v497_v12, %v493_v11  ;;  %p3029_p4 = scmp.ne.s32.totalorder %s2032_s1, %s3028_s25  ;;  %p3034_p6 = scmp.lt.s32.totalorder %s3028_s25, %s3028_s25 }
  0x7d   :  { %2242 = vmatpush1.bf16.msra.mxu1 %v3251_v26  ;;  %264 = vmatprep.mubr.f32.mxu0 %v3090_v0 }
  0x7e   :  { %377 = vmatprep.mubr.f32.mxu1 %v3090_v0  ;;  %2212 = vmatprep.subr.bf16.mxu0 %v3255_v29  ;;  %p3035_p7 = por %p3034_p6, %p3033_p5 }
  0x7f   :  { %265 = vmatmul.mubr.f32.gmra.mrb[8].mxu0 %v86_v35  ;;  %2244 = vmatprep.subr.bf16.mxu1 %v3258_v32 }
  0x80   :  { %378 = vmatmul.mubr.f32.gmra.mrb[8].mxu1 %v86_v35  ;;  %2214 = vmatpush1.bf16.msra.mxu0 %v3261_v36  ;;  %v3357_v35 = vrot.slane %v154_v33, %v158_v31  ;;  %p3036_p8 = pnand %p3035_p7, %p3029_p4 }
  0x81   :  { %2246 = vmatpush1.bf16.msra.mxu1 %v3265_v40  ;;  %270 = vmatprep.mubr.f32.mxu0 %v3090_v0 }
  0x82   :  { %383 = vmatprep.mubr.f32.mxu1 %v3090_v0  ;;  %2216 = vmatprep.subr.bf16.mxu0 %v3269_v44 }
  0x83   :  { %271 = vmatmul.mubr.f32.gmra.mrb[10].mxu0 %v87_v52  ;;  %2248 = vmatprep.subr.bf16.mxu1 %v3272_v48 }
  0x84   :  { %384 = vmatmul.mubr.f32.gmra.mrb[10].mxu1 %v87_v52  ;;  %2218 = vmatpush1.bf16.msra.mxu0 %v3275_v54 }
  0x85   :  { %2250 = vmatpush1.bf16.msra.mxu1 %v3279_v58  ;;  %276 = vmatprep.mubr.f32.mxu0 %v3090_v0 }
  0x86   :  { %389 = vmatprep.mubr.f32.mxu1 %v3090_v0  ;;  %2220 = vmatprep.subr.bf16.mxu0 %v3283_v62 }
  0x87   :  { %277 = vmatmul.mubr.f32.gmra.mrb[12].mxu0 %v88_v8  ;;  %2252 = vmatprep.subr.bf16.mxu1 %v3286_v4 }
  0x88   :  { %390 = vmatmul.mubr.f32.gmra.mrb[12].mxu1 %v88_v8  ;;  %2222 = vmatpush1.bf16.msra.mxu0 %v3289_v9 }
  0x89   :  { %2254 = vmatpush1.bf16.msra.mxu1 %v3293_v14  ;;  %282 = vmatprep.mubr.f32.mxu0 %v3090_v0 }
  0x8a   :  { %395 = vmatprep.mubr.f32.mxu1 %v3090_v0  ;;  %2224 = vmatprep.subr.bf16.mxu0 %v3297_v18 }
  0x8b   :  { %283 = vmatmul.mubr.f32.gmra.mrb[14].mxu0 %v89_v24  ;;  %2256 = vmatprep.subr.bf16.mxu1 %v3300_v22 }
  0x8c   :  { %396 = vmatmul.mubr.f32.gmra.mrb[14].mxu1 %v89_v24  ;;  %2226 = vmatpush1.bf16.msra.mxu0 %v3303_v25 }
  0x8d   :  { %2258 = vmatpush1.bf16.msra.mxu1 %v3307_v27  ;;  %569 = vmatprep.mubr.f32.mxu0 %v3090_v0 }
  0x8e   :  { %640 = vmatprep.mubr.f32.mxu1 %v3090_v0  ;;  %2260 = vmatprep.subr.bf16.mxu0 %v3204_v38 }
  0x8f   :  { %570 = vmatmul.mubr.f32.vlgmr.msra.gmra.mrb[0].mxu0 %v3090_v0  ;;  %2292 = vmatprep.subr.bf16.mxu1 %v3206_v41 }
  0x90   :  { %641 = vmatmul.mubr.f32.vlgmr.msra.gmra.mrb[0].mxu1 %v3090_v0  ;;  %2262 = vmatpush1.bf16.msra.mxu0 %v3208_v47 }
  0x91   :  { %2294 = vmatpush1.bf16.msra.mxu1 %v3211_v50  ;;  %2264 = vmatprep.subr.bf16.mxu0 %v3214_v53 }
  0x92   :  { %2296 = vmatprep.subr.bf16.mxu1 %v3216_v56  ;;  %746 = vmatprep.mubr.f32.mxu0 %v3090_v0 }
  0x93   :  { %817 = vmatprep.mubr.f32.mxu1 %v3090_v0 }
  0x94   :  { %2266 = vmatpush1.bf16.msra.mxu0 %v3219_v60 }
  0x95   :  { %2298 = vmatpush1.bf16.msra.mxu1 %v3223_v63  ;;  %2268 = vmatprep.subr.bf16.mxu0 %v3227_v3 }
  0x96   :  { %2300 = vmatprep.subr.bf16.mxu1 %v3230_v6 }
  0x98   :  { %2270 = vmatpush1.bf16.msra.mxu0 %v3233_v10 }
  0x99   :  { %2302 = vmatpush1.bf16.msra.mxu1 %v3237_v13  ;;  %2272 = vmatprep.subr.bf16.mxu0 %v3241_v16 }
  0x9a   :  { %2304 = vmatprep.subr.bf16.mxu1 %v3244_v19 }
  0x9c   :  { %2274 = vmatpush1.bf16.msra.mxu0 %v3247_v23 }
  0x9d   :  { %2306 = vmatpush1.bf16.msra.mxu1 %v3251_v26  ;;  %2276 = vmatprep.subr.bf16.mxu0 %v3255_v29 }
  0x9e   :  { %2308 = vmatprep.subr.bf16.mxu1 %v3258_v32 }
  0xa0   :  { %2278 = vmatpush1.bf16.msra.mxu0 %v3261_v36 }
  0xa1   :  { %2310 = vmatpush1.bf16.msra.mxu1 %v3265_v40  ;;  %2280 = vmatprep.subr.bf16.mxu0 %v3269_v44 }
  0xa2   :  { %2312 = vmatprep.subr.bf16.mxu1 %v3272_v48 }
  0xa4   :  { %2282 = vmatpush1.bf16.msra.mxu0 %v3275_v54 }
  0xa5   :  { %2314 = vmatpush1.bf16.msra.mxu1 %v3279_v58  ;;  %2284 = vmatprep.subr.bf16.mxu0 %v3283_v62 }
  0xa6   :  { %2316 = vmatprep.subr.bf16.mxu1 %v3286_v4 }
  0xa8   :  { %2286 = vmatpush1.bf16.msra.mxu0 %v3289_v9 }
  0xa9   :  { %2318 = vmatpush1.bf16.msra.mxu1 %v3293_v14  ;;  %2288 = vmatprep.subr.bf16.mxu0 %v3297_v18 }
  0xaa   :  { %2320 = vmatprep.subr.bf16.mxu1 %v3300_v22 }
  0xac   :  { %2290 = vmatpush1.bf16.msra.mxu0 %v3303_v25 }
  0xad   :  { %2322 = vmatpush1.bf16.msra.mxu1 %v3307_v27  ;;  %2324 = vmatprep.subr.bf16.mxu0 %v3204_v38 }
  0xae   :  { %2356 = vmatprep.subr.bf16.mxu1 %v3206_v41 }
 0x162   :  { %v571_v39 = vpop.f32.mrb[0].mxu0 }
 0x163   :  { %v2731_v43 = vadd.f32 %v571_v39, %v3357_v35  ;;  %v642_v45 = vpop.f32.mrb[0].mxu1  ;;  %v573_v46 = vpop.f32.mrb[1].mxu0 }
 0x164   :  { %v2732_v49 = vadd.f32 %v573_v46, %v3359_v37  ;;  %v644_v51 = vpop.f32.mrb[1].mxu1  ;;  %v2747_v5 = vadd.f32 %v642_v45, %v3366_v1 }
 0x165   :  { %v2053_v52 = vmul.f32 -1.442695, %v2731_v43  ;;  %v2748_v61 = vadd.f32 %v644_v51, %v3363_v57 }
 0x166   :  { %v2054_v55 = vmul.f32 -1.442695, %v2732_v49 }
 0x167   :  { %2808 = vpow2.f32 %v2053_v52  ;;  %v2055_v2 = vmul.f32 -1.442695, %v2748_v61 }
 0x168   :  { %2810 = vpow2.f32 %v2054_v55 }
 0x169   :  { %2812 = vpow2.f32 %v2055_v2 }
 0x16a   :  { %2814 = vtanh.f32 %v2747_v5 }
 0x171   :  { %v2809_v7 = vpop.eup %2808 }
 0x172   :  { %v2811_v8 = vpop.eup %2810  ;;  %v654_v11 = vadd.f32 1.0, %v2809_v7 }
 0x173   :  { %v660_v12 = vadd.f32 1.0, %v2811_v8  ;;  %v2813_v15 = vpop.eup %2812 }
 0x174   :  { %2816 = vrcp.f32 %v654_v11  ;;  %v2815_v17 = vpop.eup %2814  ;;  %v667_v28 = vadd.f32 1.0, %v2813_v15 }
 0x175   :  { %2818 = vrcp.f32 %v660_v12 }
 0x176   :  { %2820 = vrcp.f32 %v667_v28 }
 0x17e   :  { %v2817_v20 = vpop.eup %2816 }
 0x17f   :  { %v2819_v21 = vpop.eup %2818  ;;  %v671_v24 = vmul.f32 %v2817_v20, %v2815_v17 }
 0x180   :  { %v670_v30 = vmul.f32 0.0, %v2819_v21  ;;  %v2821_v33 = vpop.eup %2820 }
 0x182   :  { %v3369_v31 = vadd.f32 %v671_v24, %v670_v30 }
 0x184   :  { %2822 = vtanh.f32 %v3369_v31 }
 0x18e   :  { %v2823_v34 = vpop.eup %2822 }
 0x18f   :  { %v674_v39 = vmul.f32 %v2823_v34, %v2821_v33 }
 0x191   :  { %747 = vmatmul.mubr.f32.vlgmr.msra.gmra.mrb[2].mxu0 %v674_v39  ;;  %818 = vmatmul.mubr.f32.vlgmr.msra.gmra.mrb[2].mxu1 %v674_v39 }
 0x192   :  { %2326 = vmatpush1.bf16.msra.mxu0 %v3208_v47  ;;  %2358 = vmatpush1.bf16.msra.mxu1 %v3211_v50 }
 0x193   :  { %2328 = vmatprep.subr.bf16.mxu0 %v3214_v53  ;;  %2360 = vmatprep.subr.bf16.mxu1 %v3216_v56 }
 0x194   :  { %923 = vmatprep.mubr.f32.mxu0 %v3090_v0  ;;  %994 = vmatprep.mubr.f32.mxu1 %v3090_v0 }
 0x196   :  { %2330 = vmatpush1.bf16.msra.mxu0 %v3219_v60  ;;  %2362 = vmatpush1.bf16.msra.mxu1 %v3223_v63 }
 0x197   :  { %2332 = vmatprep.subr.bf16.mxu0 %v3227_v3  ;;  %2364 = vmatprep.subr.bf16.mxu1 %v3230_v6 }
 0x19a   :  { %2334 = vmatpush1.bf16.msra.mxu0 %v3233_v10  ;;  %2366 = vmatpush1.bf16.msra.mxu1 %v3237_v13 }
 0x19b   :  { %2336 = vmatprep.subr.bf16.mxu0 %v3241_v16  ;;  %2368 = vmatprep.subr.bf16.mxu1 %v3244_v19 }
 0x19e   :  { %2338 = vmatpush1.bf16.msra.mxu0 %v3247_v23  ;;  %2370 = vmatpush1.bf16.msra.mxu1 %v3251_v26 }
 0x19f   :  { %2340 = vmatprep.subr.bf16.mxu0 %v3255_v29  ;;  %2372 = vmatprep.subr.bf16.mxu1 %v3258_v32 }
 0x1a2   :  { %2342 = vmatpush1.bf16.msra.mxu0 %v3261_v36  ;;  %2374 = vmatpush1.bf16.msra.mxu1 %v3265_v40 }
 0x1a3   :  { %2344 = vmatprep.subr.bf16.mxu0 %v3269_v44  ;;  %2376 = vmatprep.subr.bf16.mxu1 %v3272_v48 }
 0x1a6   :  { %2346 = vmatpush1.bf16.msra.mxu0 %v3275_v54  ;;  %2378 = vmatpush1.bf16.msra.mxu1 %v3279_v58 }
 0x1a7   :  { %2348 = vmatprep.subr.bf16.mxu0 %v3283_v62  ;;  %2380 = vmatprep.subr.bf16.mxu1 %v3286_v4 }
 0x1aa   :  { %2350 = vmatpush1.bf16.msra.mxu0 %v3289_v9  ;;  %2382 = vmatpush1.bf16.msra.mxu1 %v3293_v14 }
 0x1ab   :  { %2352 = vmatprep.subr.bf16.mxu0 %v3297_v18  ;;  %2384 = vmatprep.subr.bf16.mxu1 %v3300_v22 }
 0x1ae   :  { %2354 = vmatpush1.bf16.msra.mxu0 %v3303_v25  ;;  %2386 = vmatpush1.bf16.msra.mxu1 %v3307_v27 }
 0x1af   :  { %2388 = vmatprep.subr.bf16.mxu0 %v3204_v38  ;;  %2420 = vmatprep.subr.bf16.mxu1 %v3206_v41 }
 0x264   :  { %v748_v42 = vpop.f32.mrb[2].mxu0  ;;  %v819_v43 = vpop.f32.mrb[2].mxu1 }
 0x265   :  { %v2733_v45 = vadd.f32 %v748_v42, %v3357_v35  ;;  %v750_v46 = vpop.f32.mrb[3].mxu0  ;;  %v821_v49 = vpop.f32.mrb[3].mxu1  ;;  %v2749_v2 = vadd.f32 %v819_v43, %v3366_v1 }
 0x266   :  { %v2734_v51 = vadd.f32 %v750_v46, %v3359_v37  ;;  %v2750_v59 = vadd.f32 %v821_v49, %v3363_v57 }
 0x267   :  { %v2056_v52 = vmul.f32 -1.442695, %v2733_v45 }
 0x268   :  { %v2057_v55 = vmul.f32 -1.442695, %v2734_v51  ;;  %v2058_v61 = vmul.f32 -1.442695, %v2750_v59 }
 0x269   :  { %2824 = vpow2.f32 %v2056_v52 }
 0x26a   :  { %2826 = vpow2.f32 %v2057_v55 }
 0x26b   :  { %2828 = vpow2.f32 %v2058_v61 }
 0x26c   :  { %2830 = vtanh.f32 %v2749_v2 }
 0x273   :  { %v2825_v5 = vpop.eup %2824 }
 0x274   :  { %v2827_v7 = vpop.eup %2826  ;;  %v831_v8 = vadd.f32 1.0, %v2825_v5 }
 0x275   :  { %v837_v11 = vadd.f32 1.0, %v2827_v7  ;;  %v2829_v12 = vpop.eup %2828 }
 0x276   :  { %2832 = vrcp.f32 %v831_v8  ;;  %v2831_v15 = vpop.eup %2830  ;;  %v844_v24 = vadd.f32 1.0, %v2829_v12 }
 0x277   :  { %2834 = vrcp.f32 %v837_v11 }
 0x278   :  { %2836 = vrcp.f32 %v844_v24 }
 0x280   :  { %v2833_v17 = vpop.eup %2832 }
 0x281   :  { %v2835_v20 = vpop.eup %2834  ;;  %v848_v21 = vmul.f32 %v2833_v17, %v2831_v15 }
 0x282   :  { %v847_v28 = vmul.f32 %v2835_v20, %v3369_v31  ;;  %v2837_v33 = vpop.eup %2836 }
 0x284   :  { %v3411_v30 = vadd.f32 %v848_v21, %v847_v28 }
 0x286   :  { %2838 = vtanh.f32 %v3411_v30 }
 0x290   :  { %v2839_v34 = vpop.eup %2838 }
 0x291   :  { %v851_v39 = vmul.f32 %v2839_v34, %v2837_v33 }
 0x293   :  { %924 = vmatmul.mubr.f32.vlgmr.msra.gmra.mrb[4].mxu0 %v851_v39  ;;  %995 = vmatmul.mubr.f32.vlgmr.msra.gmra.mrb[4].mxu1 %v851_v39 }
 0x294   :  { %2390 = vmatpush1.bf16.msra.mxu0 %v3208_v47  ;;  %2422 = vmatpush1.bf16.msra.mxu1 %v3211_v50 }
 0x295   :  { %2392 = vmatprep.subr.bf16.mxu0 %v3214_v53  ;;  %2424 = vmatprep.subr.bf16.mxu1 %v3216_v56 }
 0x296   :  { %1100 = vmatprep.mubr.f32.mxu0 %v3090_v0  ;;  %1171 = vmatprep.mubr.f32.mxu1 %v3090_v0 }
 0x298   :  { %2394 = vmatpush1.bf16.msra.mxu0 %v3219_v60  ;;  %2426 = vmatpush1.bf16.msra.mxu1 %v3223_v63 }
 0x299   :  { %2396 = vmatprep.subr.bf16.mxu0 %v3227_v3  ;;  %2428 = vmatprep.subr.bf16.mxu1 %v3230_v6 }
 0x29c   :  { %2398 = vmatpush1.bf16.msra.mxu0 %v3233_v10  ;;  %2430 = vmatpush1.bf16.msra.mxu1 %v3237_v13 }
 0x29d   :  { %2400 = vmatprep.subr.bf16.mxu0 %v3241_v16  ;;  %2432 = vmatprep.subr.bf16.mxu1 %v3244_v19 }
 0x2a0   :  { %2402 = vmatpush1.bf16.msra.mxu0 %v3247_v23  ;;  %2434 = vmatpush1.bf16.msra.mxu1 %v3251_v26 }
 0x2a1   :  { %2404 = vmatprep.subr.bf16.mxu0 %v3255_v29  ;;  %2436 = vmatprep.subr.bf16.mxu1 %v3258_v32 }
 0x2a4   :  { %2406 = vmatpush1.bf16.msra.mxu0 %v3261_v36  ;;  %2438 = vmatpush1.bf16.msra.mxu1 %v3265_v40 }
 0x2a5   :  { %2408 = vmatprep.subr.bf16.mxu0 %v3269_v44  ;;  %2440 = vmatprep.subr.bf16.mxu1 %v3272_v48 }
 0x2a8   :  { %2410 = vmatpush1.bf16.msra.mxu0 %v3275_v54  ;;  %2442 = vmatpush1.bf16.msra.mxu1 %v3279_v58 }
 0x2a9   :  { %2412 = vmatprep.subr.bf16.mxu0 %v3283_v62  ;;  %2444 = vmatprep.subr.bf16.mxu1 %v3286_v4 }
 0x2ac   :  { %2414 = vmatpush1.bf16.msra.mxu0 %v3289_v9  ;;  %2446 = vmatpush1.bf16.msra.mxu1 %v3293_v14 }
 0x2ad   :  { %2416 = vmatprep.subr.bf16.mxu0 %v3297_v18  ;;  %2448 = vmatprep.subr.bf16.mxu1 %v3300_v22 }
 0x2b0   :  { %2418 = vmatpush1.bf16.msra.mxu0 %v3303_v25  ;;  %2450 = vmatpush1.bf16.msra.mxu1 %v3307_v27 }
 0x2b1   :  { %2452 = vmatprep.subr.bf16.mxu0 %v3204_v38  ;;  %2484 = vmatprep.subr.bf16.mxu1 %v3206_v41 }
 0x366   :  { %v925_v31 = vpop.f32.mrb[4].mxu0  ;;  %v996_v42 = vpop.f32.mrb[4].mxu1 }
 0x367   :  { %v2735_v43 = vadd.f32 %v925_v31, %v3357_v35  ;;  %v927_v45 = vpop.f32.mrb[5].mxu0  ;;  %v998_v46 = vpop.f32.mrb[5].mxu1  ;;  %v2751_v61 = vadd.f32 %v996_v42, %v3366_v1 }
 0x368   :  { %v2736_v49 = vadd.f32 %v927_v45, %v3359_v37  ;;  %v2752_v55 = vadd.f32 %v998_v46, %v3363_v57 }
 0x369   :  { %v2059_v51 = vmul.f32 -1.442695, %v2735_v43 }
 0x36a   :  { %v2060_v52 = vmul.f32 -1.442695, %v2736_v49  ;;  %v2061_v59 = vmul.f32 -1.442695, %v2752_v55 }
 0x36b   :  { %2840 = vpow2.f32 %v2059_v51 }
 0x36c   :  { %2842 = vpow2.f32 %v2060_v52 }
 0x36d   :  { %2844 = vpow2.f32 %v2061_v59 }
 0x36e   :  { %2846 = vtanh.f32 %v2751_v61 }
 0x375   :  { %v2841_v2 = vpop.eup %2840 }
 0x376   :  { %v2843_v5 = vpop.eup %2842  ;;  %v1008_v7 = vadd.f32 1.0, %v2841_v2 }
 0x377   :  { %v1014_v8 = vadd.f32 1.0, %v2843_v5  ;;  %v2845_v11 = vpop.eup %2844 }
 0x378   :  { %2848 = vrcp.f32 %v1008_v7  ;;  %v2847_v12 = vpop.eup %2846  ;;  %v1021_v21 = vadd.f32 1.0, %v2845_v11 }
 0x379   :  { %2850 = vrcp.f32 %v1014_v8 }
 0x37a   :  { %2852 = vrcp.f32 %v1021_v21 }
 0x382   :  { %v2849_v15 = vpop.eup %2848 }
 0x383   :  { %v2851_v17 = vpop.eup %2850  ;;  %v1025_v20 = vmul.f32 %v2849_v15, %v2847_v12 }
 0x384   :  { %v1024_v24 = vmul.f32 %v2851_v17, %v3411_v30  ;;  %v2853_v33 = vpop.eup %2852 }
 0x386   :  { %v3453_v28 = vadd.f32 %v1025_v20, %v1024_v24 }
 0x388   :  { %2854 = vtanh.f32 %v3453_v28 }
 0x392   :  { %v2855_v34 = vpop.eup %2854 }
 0x393   :  { %v1028_v39 = vmul.f32 %v2855_v34, %v2853_v33 }
 0x395   :  { %1101 = vmatmul.mubr.f32.vlgmr.msra.gmra.mrb[6].mxu0 %v1028_v39  ;;  %1172 = vmatmul.mubr.f32.vlgmr.msra.gmra.mrb[6].mxu1 %v1028_v39 }
 0x396   :  { %2454 = vmatpush1.bf16.msra.mxu0 %v3208_v47  ;;  %2486 = vmatpush1.bf16.msra.mxu1 %v3211_v50 }
 0x397   :  { %2456 = vmatprep.subr.bf16.mxu0 %v3214_v53  ;;  %2488 = vmatprep.subr.bf16.mxu1 %v3216_v56 }
 0x398   :  { %1277 = vmatprep.mubr.f32.mxu0 %v3090_v0  ;;  %1348 = vmatprep.mubr.f32.mxu1 %v3090_v0 }
 0x39a   :  { %2458 = vmatpush1.bf16.msra.mxu0 %v3219_v60  ;;  %2490 = vmatpush1.bf16.msra.mxu1 %v3223_v63 }
 0x39b   :  { %2460 = vmatprep.subr.bf16.mxu0 %v3227_v3  ;;  %2492 = vmatprep.subr.bf16.mxu1 %v3230_v6 }
 0x39e   :  { %2462 = vmatpush1.bf16.msra.mxu0 %v3233_v10  ;;  %2494 = vmatpush1.bf16.msra.mxu1 %v3237_v13 }
 0x39f   :  { %2464 = vmatprep.subr.bf16.mxu0 %v3241_v16  ;;  %2496 = vmatprep.subr.bf16.mxu1 %v3244_v19 }
 0x3a2   :  { %2466 = vmatpush1.bf16.msra.mxu0 %v3247_v23  ;;  %2498 = vmatpush1.bf16.msra.mxu1 %v3251_v26 }
 0x3a3   :  { %2468 = vmatprep.subr.bf16.mxu0 %v3255_v29  ;;  %2500 = vmatprep.subr.bf16.mxu1 %v3258_v32 }
 0x3a6   :  { %2470 = vmatpush1.bf16.msra.mxu0 %v3261_v36  ;;  %2502 = vmatpush1.bf16.msra.mxu1 %v3265_v40 }
 0x3a7   :  { %2472 = vmatprep.subr.bf16.mxu0 %v3269_v44  ;;  %2504 = vmatprep.subr.bf16.mxu1 %v3272_v48 }
 0x3aa   :  { %2474 = vmatpush1.bf16.msra.mxu0 %v3275_v54  ;;  %2506 = vmatpush1.bf16.msra.mxu1 %v3279_v58 }
 0x3ab   :  { %2476 = vmatprep.subr.bf16.mxu0 %v3283_v62  ;;  %2508 = vmatprep.subr.bf16.mxu1 %v3286_v4 }
 0x3ae   :  { %2478 = vmatpush1.bf16.msra.mxu0 %v3289_v9  ;;  %2510 = vmatpush1.bf16.msra.mxu1 %v3293_v14 }
 0x3af   :  { %2480 = vmatprep.subr.bf16.mxu0 %v3297_v18  ;;  %2512 = vmatprep.subr.bf16.mxu1 %v3300_v22 }
 0x3b2   :  { %2482 = vmatpush1.bf16.msra.mxu0 %v3303_v25  ;;  %2514 = vmatpush1.bf16.msra.mxu1 %v3307_v27 }
 0x3b3   :  { %2516 = vmatprep.subr.bf16.mxu0 %v3204_v38  ;;  %2548 = vmatprep.subr.bf16.mxu1 %v3206_v41 }
 0x468   :  { %v1102_v30 = vpop.f32.mrb[6].mxu0  ;;  %v1173_v31 = vpop.f32.mrb[6].mxu1 }
 0x469   :  { %v2737_v42 = vadd.f32 %v1102_v30, %v3357_v35  ;;  %v1104_v43 = vpop.f32.mrb[7].mxu0  ;;  %v1175_v45 = vpop.f32.mrb[7].mxu1  ;;  %v2753_v59 = vadd.f32 %v1173_v31, %v3366_v1 }
 0x46a   :  { %v2738_v46 = vadd.f32 %v1104_v43, %v3359_v37  ;;  %v2754_v52 = vadd.f32 %v1175_v45, %v3363_v57 }
 0x46b   :  { %v2062_v49 = vmul.f32 -1.442695, %v2737_v42 }
 0x46c   :  { %v2063_v51 = vmul.f32 -1.442695, %v2738_v46  ;;  %v2064_v55 = vmul.f32 -1.442695, %v2754_v52 }
 0x46d   :  { %2856 = vpow2.f32 %v2062_v49 }
 0x46e   :  { %2858 = vpow2.f32 %v2063_v51 }
 0x46f   :  { %2860 = vpow2.f32 %v2064_v55 }
 0x470   :  { %2862 = vtanh.f32 %v2753_v59 }
 0x477   :  { %v2857_v61 = vpop.eup %2856 }
 0x478   :  { %v2859_v2 = vpop.eup %2858  ;;  %v1185_v5 = vadd.f32 1.0, %v2857_v61 }
 0x479   :  { %v1191_v7 = vadd.f32 1.0, %v2859_v2  ;;  %v2861_v8 = vpop.eup %2860 }
 0x47a   :  { %2864 = vrcp.f32 %v1185_v5  ;;  %v2863_v11 = vpop.eup %2862  ;;  %v1198_v20 = vadd.f32 1.0, %v2861_v8 }
 0x47b   :  { %2866 = vrcp.f32 %v1191_v7 }
 0x47c   :  { %2868 = vrcp.f32 %v1198_v20 }
 0x484   :  { %v2865_v12 = vpop.eup %2864 }
 0x485   :  { %v2867_v15 = vpop.eup %2866  ;;  %v1202_v17 = vmul.f32 %v2865_v12, %v2863_v11 }
 0x486   :  { %v1201_v21 = vmul.f32 %v2867_v15, %v3453_v28  ;;  %v2869_v33 = vpop.eup %2868 }
 0x488   :  { %v3495_v24 = vadd.f32 %v1202_v17, %v1201_v21 }
 0x48a   :  { %2870 = vtanh.f32 %v3495_v24 }
 0x494   :  { %v2871_v34 = vpop.eup %2870 }
 0x495   :  { %v1205_v39 = vmul.f32 %v2871_v34, %v2869_v33 }
 0x497   :  { %1278 = vmatmul.mubr.f32.vlgmr.msra.gmra.mrb[8].mxu0 %v1205_v39  ;;  %1349 = vmatmul.mubr.f32.vlgmr.msra.gmra.mrb[8].mxu1 %v1205_v39 }
 0x498   :  { %2518 = vmatpush1.bf16.msra.mxu0 %v3208_v47  ;;  %2550 = vmatpush1.bf16.msra.mxu1 %v3211_v50 }
 0x499   :  { %2520 = vmatprep.subr.bf16.mxu0 %v3214_v53  ;;  %2552 = vmatprep.subr.bf16.mxu1 %v3216_v56 }
 0x49a   :  { %1454 = vmatprep.mubr.f32.mxu0 %v3090_v0  ;;  %1525 = vmatprep.mubr.f32.mxu1 %v3090_v0 }
 0x49c   :  { %2522 = vmatpush1.bf16.msra.mxu0 %v3219_v60  ;;  %2554 = vmatpush1.bf16.msra.mxu1 %v3223_v63 }
 0x49d   :  { %2524 = vmatprep.subr.bf16.mxu0 %v3227_v3  ;;  %2556 = vmatprep.subr.bf16.mxu1 %v3230_v6 }
 0x4a0   :  { %2526 = vmatpush1.bf16.msra.mxu0 %v3233_v10  ;;  %2558 = vmatpush1.bf16.msra.mxu1 %v3237_v13 }
 0x4a1   :  { %2528 = vmatprep.subr.bf16.mxu0 %v3241_v16  ;;  %2560 = vmatprep.subr.bf16.mxu1 %v3244_v19 }
 0x4a4   :  { %2530 = vmatpush1.bf16.msra.mxu0 %v3247_v23  ;;  %2562 = vmatpush1.bf16.msra.mxu1 %v3251_v26 }
 0x4a5   :  { %2532 = vmatprep.subr.bf16.mxu0 %v3255_v29  ;;  %2564 = vmatprep.subr.bf16.mxu1 %v3258_v32 }
 0x4a8   :  { %2534 = vmatpush1.bf16.msra.mxu0 %v3261_v36  ;;  %2566 = vmatpush1.bf16.msra.mxu1 %v3265_v40 }
 0x4a9   :  { %2536 = vmatprep.subr.bf16.mxu0 %v3269_v44  ;;  %2568 = vmatprep.subr.bf16.mxu1 %v3272_v48 }
 0x4ac   :  { %2538 = vmatpush1.bf16.msra.mxu0 %v3275_v54  ;;  %2570 = vmatpush1.bf16.msra.mxu1 %v3279_v58 }
 0x4ad   :  { %2540 = vmatprep.subr.bf16.mxu0 %v3283_v62  ;;  %2572 = vmatprep.subr.bf16.mxu1 %v3286_v4 }
 0x4b0   :  { %2542 = vmatpush1.bf16.msra.mxu0 %v3289_v9  ;;  %2574 = vmatpush1.bf16.msra.mxu1 %v3293_v14 }
 0x4b1   :  { %2544 = vmatprep.subr.bf16.mxu0 %v3297_v18  ;;  %2576 = vmatprep.subr.bf16.mxu1 %v3300_v22 }
 0x4b4   :  { %2546 = vmatpush1.bf16.msra.mxu0 %v3303_v25  ;;  %2578 = vmatpush1.bf16.msra.mxu1 %v3307_v27 }
 0x4b5   :  { %2580 = vmatprep.subr.bf16.mxu0 %v3204_v38  ;;  %2612 = vmatprep.subr.bf16.mxu1 %v3206_v41 }
 0x56a   :  { %v1279_v28 = vpop.f32.mrb[8].mxu0  ;;  %v1350_v30 = vpop.f32.mrb[8].mxu1 }
 0x56b   :  { %v2739_v31 = vadd.f32 %v1279_v28, %v3357_v35  ;;  %v1281_v42 = vpop.f32.mrb[9].mxu0  ;;  %v1352_v43 = vpop.f32.mrb[9].mxu1  ;;  %v2755_v55 = vadd.f32 %v1350_v30, %v3366_v1 }
 0x56c   :  { %v2740_v45 = vadd.f32 %v1281_v42, %v3359_v37  ;;  %v2756_v51 = vadd.f32 %v1352_v43, %v3363_v57 }
 0x56d   :  { %v2065_v46 = vmul.f32 -1.442695, %v2739_v31 }
 0x56e   :  { %v2066_v49 = vmul.f32 -1.442695, %v2740_v45  ;;  %v2067_v52 = vmul.f32 -1.442695, %v2756_v51 }
 0x56f   :  { %2872 = vpow2.f32 %v2065_v46 }
 0x570   :  { %2874 = vpow2.f32 %v2066_v49 }
 0x571   :  { %2876 = vpow2.f32 %v2067_v52 }
 0x572   :  { %2878 = vtanh.f32 %v2755_v55 }
 0x579   :  { %v2873_v59 = vpop.eup %2872 }
 0x57a   :  { %v2875_v61 = vpop.eup %2874  ;;  %v1362_v2 = vadd.f32 1.0, %v2873_v59 }
 0x57b   :  { %v1368_v5 = vadd.f32 1.0, %v2875_v61  ;;  %v2877_v7 = vpop.eup %2876 }
 0x57c   :  { %2880 = vrcp.f32 %v1362_v2  ;;  %v2879_v8 = vpop.eup %2878  ;;  %v1375_v17 = vadd.f32 1.0, %v2877_v7 }
 0x57d   :  { %2882 = vrcp.f32 %v1368_v5 }
 0x57e   :  { %2884 = vrcp.f32 %v1375_v17 }
 0x586   :  { %v2881_v11 = vpop.eup %2880 }
 0x587   :  { %v2883_v12 = vpop.eup %2882  ;;  %v1379_v15 = vmul.f32 %v2881_v11, %v2879_v8 }
 0x588   :  { %v1378_v20 = vmul.f32 %v2883_v12, %v3495_v24  ;;  %v2885_v33 = vpop.eup %2884 }
 0x58a   :  { %v3537_v21 = vadd.f32 %v1379_v15, %v1378_v20 }
 0x58c   :  { %2886 = vtanh.f32 %v3537_v21 }
 0x596   :  { %v2887_v34 = vpop.eup %2886 }
 0x597   :  { %v1382_v39 = vmul.f32 %v2887_v34, %v2885_v33  ;;  %v1917_v34 = vld [vmem:[#allocation9 + $0x18] sm:$0xff] }
 0x599   :  { %1455 = vmatmul.mubr.f32.vlgmr.msra.gmra.mrb[10].mxu0 %v1382_v39  ;;  %1526 = vmatmul.mubr.f32.vlgmr.msra.gmra.mrb[10].mxu1 %v1382_v39 }
 0x59a   :  { %2582 = vmatpush1.bf16.msra.mxu0 %v3208_v47  ;;  %2614 = vmatpush1.bf16.msra.mxu1 %v3211_v50 }
 0x59b   :  { %2584 = vmatprep.subr.bf16.mxu0 %v3214_v53  ;;  %2616 = vmatprep.subr.bf16.mxu1 %v3216_v56 }
 0x59c   :  { %1631 = vmatprep.mubr.f32.mxu0 %v3090_v0  ;;  %1702 = vmatprep.mubr.f32.mxu1 %v3090_v0 }
 0x59e   :  { %2586 = vmatpush1.bf16.msra.mxu0 %v3219_v60  ;;  %2618 = vmatpush1.bf16.msra.mxu1 %v3223_v63 }
 0x59f   :  { %2588 = vmatprep.subr.bf16.mxu0 %v3227_v3  ;;  %2620 = vmatprep.subr.bf16.mxu1 %v3230_v6 }
 0x5a2   :  { %2590 = vmatpush1.bf16.msra.mxu0 %v3233_v10  ;;  %2622 = vmatpush1.bf16.msra.mxu1 %v3237_v13 }
 0x5a3   :  { %2592 = vmatprep.subr.bf16.mxu0 %v3241_v16  ;;  %2624 = vmatprep.subr.bf16.mxu1 %v3244_v19 }
 0x5a6   :  { %2594 = vmatpush1.bf16.msra.mxu0 %v3247_v23  ;;  %2626 = vmatpush1.bf16.msra.mxu1 %v3251_v26 }
 0x5a7   :  { %2596 = vmatprep.subr.bf16.mxu0 %v3255_v29  ;;  %2628 = vmatprep.subr.bf16.mxu1 %v3258_v32 }
 0x5aa   :  { %2598 = vmatpush1.bf16.msra.mxu0 %v3261_v36  ;;  %2630 = vmatpush1.bf16.msra.mxu1 %v3265_v40 }
 0x5ab   :  { %2600 = vmatprep.subr.bf16.mxu0 %v3269_v44  ;;  %2632 = vmatprep.subr.bf16.mxu1 %v3272_v48 }
 0x5ae   :  { %2602 = vmatpush1.bf16.msra.mxu0 %v3275_v54  ;;  %2634 = vmatpush1.bf16.msra.mxu1 %v3279_v58 }
 0x5af   :  { %2604 = vmatprep.subr.bf16.mxu0 %v3283_v62  ;;  %2636 = vmatprep.subr.bf16.mxu1 %v3286_v4 }
 0x5b2   :  { %2606 = vmatpush1.bf16.msra.mxu0 %v3289_v9  ;;  %2638 = vmatpush1.bf16.msra.mxu1 %v3293_v14 }
 0x5b3   :  { %2608 = vmatprep.subr.bf16.mxu0 %v3297_v18  ;;  %2640 = vmatprep.subr.bf16.mxu1 %v3300_v22 }
 0x5b6   :  { %2610 = vmatpush1.bf16.msra.mxu0 %v3303_v25  ;;  %2642 = vmatpush1.bf16.msra.mxu1 %v3307_v27 }
 0x5b7   :  { %2644 = vmatprep.subr.bf16.mxu0 %v3204_v38  ;;  %2676 = vmatprep.subr.bf16.mxu1 %v3206_v41 }
 0x66c   :  { %v1456_v24 = vpop.f32.mrb[10].mxu0  ;;  %v1527_v28 = vpop.f32.mrb[10].mxu1 }
 0x66d   :  { %v2741_v30 = vadd.f32 %v1456_v24, %v3357_v35  ;;  %v1458_v31 = vpop.f32.mrb[11].mxu0  ;;  %v1529_v42 = vpop.f32.mrb[11].mxu1  ;;  %v2757_v52 = vadd.f32 %v1527_v28, %v3366_v1  ;;  %v1918_v24 = vld [vmem:[#allocation9 + $0x20] sm:$0xff]  ;;  %v1919_v28 = vld [vmem:[#allocation9 + $0x28] sm:$0xff] }
 0x66e   :  { %v2742_v43 = vadd.f32 %v1458_v31, %v3359_v37  ;;  %v2758_v49 = vadd.f32 %v1529_v42, %v3363_v57  ;;  %v1920_v31 = vld [vmem:[#allocation9 + $0x30] sm:$0xff]  ;;  %v1921_v42 = vld [vmem:[#allocation9 + $0x38] sm:$0xff] }
 0x66f   :  { %v2068_v45 = vmul.f32 -1.442695, %v2741_v30  ;;  %v2714_v30 = vpack.c.bf16 %v1919_v28, %v1918_v24 }
 0x670   :  { %v2069_v46 = vmul.f32 -1.442695, %v2742_v43  ;;  %v2070_v51 = vmul.f32 -1.442695, %v2758_v49  ;;  %v2717_v43 = vpack.c.bf16 %v1921_v42, %v1920_v31 }
 0x671   :  { %2888 = vpow2.f32 %v2068_v45  ;;  %v1922_v45 = vld [vmem:[#allocation9 + $0x40] sm:$0xff] }
 0x672   :  { %2890 = vpow2.f32 %v2069_v46  ;;  %v1923_v46 = vld [vmem:[#allocation9 + $0x48] sm:$0xff] }
 0x673   :  { %2892 = vpow2.f32 %v2070_v51  ;;  %v2720_v49 = vpack.c.bf16 %v1923_v46, %v1922_v45  ;;  %v1924_v51 = vld [vmem:[#allocation9 + $0x50] sm:$0xff] }
 0x674   :  { %2894 = vtanh.f32 %v2757_v52  ;;  %v1925_v52 = vld [vmem:[#allocation9 + $0x58] sm:$0xff] }
 0x67b   :  { %v2889_v38 = vpop.eup %2888 }
 0x67c   :  { %v2891_v55 = vpop.eup %2890  ;;  %v1539_v41 = vadd.f32 1.0, %v2889_v38  ;;  %v1926_v38 = vld [vmem:[#allocation9 + $0x60] sm:$0xff] }
 0x67d   :  { %v1545_v59 = vadd.f32 1.0, %v2891_v55  ;;  %v2893_v61 = vpop.eup %2892  ;;  %v2723_v55 = vpack.c.bf16 %v1925_v52, %v1924_v51 }
 0x67e   :  { %2896 = vrcp.f32 %v1539_v41  ;;  %v2895_v2 = vpop.eup %2894  ;;  %v1552_v11 = vadd.f32 1.0, %v2893_v61  ;;  %v1927_v41 = vld [vmem:[#allocation9 + $0x68] sm:$0xff]  ;;  %v1928_v61 = vld [vmem:[#allocation9 + $0x70] sm:$0xff] }
 0x67f   :  { %2898 = vrcp.f32 %v1545_v59  ;;  %v2726_v59 = vpack.c.bf16 %v1927_v41, %v1926_v38 }
 0x680   :  { %2900 = vrcp.f32 %v1552_v11 }
 0x688   :  { %v2897_v5 = vpop.eup %2896 }
 0x689   :  { %v2899_v7 = vpop.eup %2898  ;;  %v1556_v8 = vmul.f32 %v2897_v5, %v2895_v2  ;;  %v1929_v2 = vld [vmem:[#allocation9 + $0x78] sm:$0xff] }
 0x68a   :  { %v1555_v12 = vmul.f32 %v2899_v7, %v3537_v21  ;;  %v2901_v17 = vpop.eup %2900  ;;  %v1916_v21 = vld [vmem:[#allocation9 + $0x10] sm:$0xff]  ;;  %v2729_v5 = vpack.c.bf16 %v1929_v2, %v1928_v61 }
 0x68b   :  { %v2711_v39 = vpack.c.bf16 %v1917_v34, %v1916_v21 }
 0x68c   :  { %v3579_v15 = vadd.f32 %v1556_v8, %v1555_v12 }
 0x68e   :  { %2902 = vtanh.f32 %v3579_v15 }
 0x698   :  { %v2903_v20 = vpop.eup %2902 }
 0x699   :  { %v1559_v33 = vmul.f32 %v2903_v20, %v2901_v17 }
 0x69b   :  { %1632 = vmatmul.mubr.f32.vlgmr.msra.gmra.mrb[12].mxu0 %v1559_v33  ;;  %1703 = vmatmul.mubr.f32.vlgmr.msra.gmra.mrb[12].mxu1 %v1559_v33 }
 0x69c   :  { %2646 = vmatpush1.bf16.msra.mxu0 %v3208_v47  ;;  %2678 = vmatpush1.bf16.msra.mxu1 %v3211_v50 }
 0x69d   :  { %2648 = vmatprep.subr.bf16.mxu0 %v3214_v53  ;;  %2680 = vmatprep.subr.bf16.mxu1 %v3216_v56 }
 0x69e   :  { %1808 = vmatprep.mubr.f32.mxu0 %v3090_v0  ;;  %1879 = vmatprep.mubr.f32.mxu1 %v3090_v0 }
 0x6a0   :  { %2650 = vmatpush1.bf16.msra.mxu0 %v3219_v60  ;;  %2682 = vmatpush1.bf16.msra.mxu1 %v3223_v63 }
 0x6a1   :  { %2652 = vmatprep.subr.bf16.mxu0 %v3227_v3  ;;  %2684 = vmatprep.subr.bf16.mxu1 %v3230_v6 }
 0x6a4   :  { %2654 = vmatpush1.bf16.msra.mxu0 %v3233_v10  ;;  %2686 = vmatpush1.bf16.msra.mxu1 %v3237_v13 }
 0x6a5   :  { %2656 = vmatprep.subr.bf16.mxu0 %v3241_v16  ;;  %2688 = vmatprep.subr.bf16.mxu1 %v3244_v19 }
 0x6a8   :  { %2658 = vmatpush1.bf16.msra.mxu0 %v3247_v23  ;;  %2690 = vmatpush1.bf16.msra.mxu1 %v3251_v26 }
 0x6a9   :  { %2660 = vmatprep.subr.bf16.mxu0 %v3255_v29  ;;  %2692 = vmatprep.subr.bf16.mxu1 %v3258_v32 }
 0x6ac   :  { %2662 = vmatpush1.bf16.msra.mxu0 %v3261_v36  ;;  %2694 = vmatpush1.bf16.msra.mxu1 %v3265_v40 }
 0x6ad   :  { %2664 = vmatprep.subr.bf16.mxu0 %v3269_v44  ;;  %2696 = vmatprep.subr.bf16.mxu1 %v3272_v48 }
 0x6b0   :  { %2666 = vmatpush1.bf16.msra.mxu0 %v3275_v54  ;;  %2698 = vmatpush1.bf16.msra.mxu1 %v3279_v58 }
 0x6b1   :  { %2668 = vmatprep.subr.bf16.mxu0 %v3283_v62  ;;  %2700 = vmatprep.subr.bf16.mxu1 %v3286_v4 }
 0x6b4   :  { %2670 = vmatpush1.bf16.msra.mxu0 %v3289_v9  ;;  %2702 = vmatpush1.bf16.msra.mxu1 %v3293_v14 }
 0x6b5   :  { %2672 = vmatprep.subr.bf16.mxu0 %v3297_v18  ;;  %2704 = vmatprep.subr.bf16.mxu1 %v3300_v22  ;;  %v1914_v18 = vld [vmem:[#allocation9] sm:$0xff]  ;;  %v1915_v22 = vld [vmem:[#allocation9 + $0x8] sm:$0xff] }
 0x6b8   :  { %2674 = vmatpush1.bf16.msra.mxu0 %v3303_v25  ;;  %2706 = vmatpush1.bf16.msra.mxu1 %v3307_v27  ;;  %v2708_v25 = vpack.c.bf16 %v1915_v22, %v1914_v18  ;;  %v3091_v27 = vmov 0.0|0.0  }
 0x6b9   :  { %2707 = vmatprep.subr.bf16.mxu0 %v3091_v27 }
 0x76e   :  { %v1633_v47 = vpop.f32.mrb[12].mxu0  ;;  %v1704_v50 = vpop.f32.mrb[12].mxu1 }
 0x76f   :  { %v2743_v53 = vadd.f32 %v1633_v47, %v3357_v35  ;;  %v1635_v56 = vpop.f32.mrb[13].mxu0  ;;  %v1706_v60 = vpop.f32.mrb[13].mxu1  ;;  %v2759_v16 = vadd.f32 %v1704_v50, %v3366_v1 }
 0x770   :  { %v2744_v63 = vadd.f32 %v1635_v56, %v3359_v37  ;;  %v2760_v10 = vadd.f32 %v1706_v60, %v3363_v57 }
 0x771   :  { %v2071_v3 = vmul.f32 -1.442695, %v2743_v53 }
 0x772   :  { %v2072_v6 = vmul.f32 -1.442695, %v2744_v63  ;;  %v2073_v13 = vmul.f32 -1.442695, %v2760_v10 }
 0x773   :  { %2904 = vpow2.f32 %v2071_v3 }
 0x774   :  { %2906 = vpow2.f32 %v2072_v6 }
 0x775   :  { %2908 = vpow2.f32 %v2073_v13 }
 0x776   :  { %2910 = vtanh.f32 %v2759_v16 }
 0x77d   :  { %v2905_v19 = vpop.eup %2904 }
 0x77e   :  { %v2907_v23 = vpop.eup %2906  ;;  %v1716_v26 = vadd.f32 1.0, %v2905_v19 }
 0x77f   :  { %v1722_v29 = vadd.f32 1.0, %v2907_v23  ;;  %v2909_v32 = vpop.eup %2908 }
 0x780   :  { %2912 = vrcp.f32 %v1716_v26  ;;  %v2911_v36 = vpop.eup %2910  ;;  %v1729_v54 = vadd.f32 1.0, %v2909_v32 }
 0x781   :  { %2914 = vrcp.f32 %v1722_v29 }
 0x782   :  { %2916 = vrcp.f32 %v1729_v54 }
 0x78a   :  { %v2913_v40 = vpop.eup %2912 }
 0x78b   :  { %v2915_v44 = vpop.eup %2914  ;;  %v1733_v48 = vmul.f32 %v2913_v40, %v2911_v36 }
 0x78c   :  { %v1732_v58 = vmul.f32 %v2915_v44, %v3579_v15  ;;  %v2917_v4 = vpop.eup %2916 }
 0x78e   :  { %v3619_v62 = vadd.f32 %v1733_v48, %v1732_v58 }
 0x790   :  { %2918 = vtanh.f32 %v3619_v62 }
 0x79a   :  { %v2919_v9 = vpop.eup %2918 }
 0x79b   :  { %v1736_v14 = vmul.f32 %v2919_v9, %v2917_v4 }
 0x79d   :  { %1809 = vmatmul.mubr.f32.vlgmr.msra.gmra.mrb[14].mxu0 %v1736_v14  ;;  %1880 = vmatmul.mubr.f32.vlgmr.msra.gmra.mrb[14].mxu1 %v1736_v14 }
 0x79e   :  { %2709 = vmatpush3.bf16.msra.mxu0 %v2708_v25  ;;  %2128 = vmatprep.mubr.msk.f32.mxu0 %vm3092_vm0, %v3090_v0 }
 0x79f   :  { %2710 = vmatprep.subr.bf16.mxu0 %v3091_v27 }
 0x7a2   :  { %2712 = vmatpush3.bf16.msra.mxu0 %v2711_v39 }
 0x7a3   :  { %2713 = vmatprep.subr.bf16.mxu0 %v3091_v27 }
 0x7a6   :  { %2715 = vmatpush3.bf16.msra.mxu0 %v2714_v30 }
 0x7a7   :  { %2716 = vmatprep.subr.bf16.mxu0 %v3091_v27 }
 0x7aa   :  { %2718 = vmatpush3.bf16.msra.mxu0 %v2717_v43 }
 0x7ab   :  { %2719 = vmatprep.subr.bf16.mxu0 %v3091_v27 }
 0x7ae   :  { %2721 = vmatpush3.bf16.msra.mxu0 %v2720_v49 }
 0x7af   :  { %2722 = vmatprep.subr.bf16.mxu0 %v3091_v27 }
 0x7b2   :  { %2724 = vmatpush3.bf16.msra.mxu0 %v2723_v55 }
 0x7b3   :  { %2725 = vmatprep.subr.bf16.mxu0 %v3091_v27 }
 0x7b6   :  { %2727 = vmatpush3.bf16.msra.mxu0 %v2726_v59 }
 0x7b7   :  { %2728 = vmatprep.subr.bf16.mxu0 %v3091_v27 }
 0x7ba   :  { %2730 = vmatpush3.bf16.msra.mxu0 %v2729_v5 }
 0x870   :  { %v1810_v7 = vpop.f32.mrb[14].mxu0  ;;  %v1881_v8 = vpop.f32.mrb[14].mxu1 }
 0x871   :  { %v2745_v11 = vadd.f32 %v1810_v7, %v3357_v35  ;;  %v1812_v12 = vpop.f32.mrb[15].mxu0  ;;  %v1883_v15 = vpop.f32.mrb[15].mxu1  ;;  %v2761_v50 = vadd.f32 %v1881_v8, %v3366_v1 }
 0x872   :  { %v2746_v17 = vadd.f32 %v1812_v12, %v3359_v37  ;;  %v2762_v0 = vadd.f32 %v1883_v15, %v3363_v57 }
 0x873   :  { %v2074_v20 = vmul.f32 -1.442695, %v2745_v11 }
 0x874   :  { %v2075_v33 = vmul.f32 -1.442695, %v2746_v17  ;;  %v2076_v47 = vmul.f32 -1.442695, %v2762_v0 }
 0x875   :  { %2920 = vpow2.f32 %v2074_v20 }
 0x876   :  { %2922 = vpow2.f32 %v2075_v33 }
 0x877   :  { %2924 = vpow2.f32 %v2076_v47 }
 0x878   :  { %2926 = vtanh.f32 %v2761_v50 }
 0x87f   :  { %v2921_v53 = vpop.eup %2920 }
 0x880   :  { %v2923_v56 = vpop.eup %2922  ;;  %v1893_v60 = vadd.f32 1.0, %v2921_v53 }
 0x881   :  { %v1899_v63 = vadd.f32 1.0, %v2923_v56  ;;  %v2925_v35 = vpop.eup %2924 }
 0x882   :  { %2928 = vrcp.f32 %v1893_v60  ;;  %v2927_v3 = vpop.eup %2926  ;;  %v1906_v13 = vadd.f32 1.0, %v2925_v35 }
 0x883   :  { %2930 = vrcp.f32 %v1899_v63 }
 0x884   :  { %2932 = vrcp.f32 %v1906_v13 }
 0x88c   :  { %v2929_v37 = vpop.eup %2928 }
 0x88d   :  { %v2931_v6 = vpop.eup %2930  ;;  %v1910_v10 = vmul.f32 %v2929_v37, %v2927_v3 }
 0x88e   :  { %v1909_v16 = vmul.f32 %v2931_v6, %v3619_v62  ;;  %v2933_v1 = vpop.eup %2932 }
 0x890   :  { %v1911_v57 = vadd.f32 %v1910_v10, %v1909_v16 }
 0x892   :  { %2934 = vtanh.f32 %v1911_v57 }
 0x89c   :  { %v2935_v19 = vpop.eup %2934 }
 0x89d   :  { %v1913_v23 = vmul.f32 %v2935_v19, %v2933_v1 }
 0x89f   :  { %2129 = vmatmul.mubr.f32.vlgmr.msra.gmra.mrb[16].mxu0 %v1913_v23  ;;  %2014 = vst [vmem:[#allocation12] sm:$0xff] %v1913_v23 }
 0x8a0   :  { %3039 = shalt.err (!%p3036_p8)
}
 0x8a1   :  { %s3040_s8 = scalar_lea.hbm %s3662_s7, 128 }
 0x8a2   :  { %p3041_p9 = scmp.ne.s32.totalorder %s3662_s7, %s3040_s8  ;;  %p3044_p10 = scmp.lt.u32.totalorder %s3040_s8, %s3662_s7 }
 0x8a4   :  { %p3046_p11 = pnand %p3044_p10, %p3041_p9 }
 0x8a6   :  { %3049 = shalt.err (!%p3046_p11)
}
 0x8a7   :  { %2034 = dma.vmem_to_hbm [thread:$0]  %s2032_s1, 128, %s3662_s7, [#allocation13]   ;;  %v2077_v26 = vld [vmem:[%s3660_s5] ss:$0 sm:$0xff] }
 0x8a8   :  { %s3094_s16 = smov [#allocation11]  }
 0x8a9   :  { %s2021_s19 = sshll.u32 %s3094_s16, 4  ;;  %s2022_s19 = int_to_ptr.vmem [resolvable:$true] %s2021_s19 }
 0x8aa   :  { %s3050_s20 = scalar_lea.vmem %s2022_s19, 128  ;;  %p3055_p13 = scmp.lt.s32.totalorder %s2022_s19, %s2022_s19 }
 0x8ab   :  { %p3051_p12 = scmp.ne.s32.totalorder %s2022_s19, %s3050_s20  ;;  %p3056_p0 = scmp.lt.s32.totalorder %s3050_s20, %s3050_s20 }
 0x8ad   :  { %p3057_p1 = por %p3056_p0, %p3055_p13 }
 0x8af   :  { %p3058_p2 = pnand %p3057_p1, %p3051_p12 }
 0x972   :  { %v2003_v29 = vpop.f32.mrb[16].mxu0 }
 0x973   :  { %v2004_v32 = vadd.f32 %v2077_v26, %v2003_v29  ;;  %v2130_v36 = vpop.f32.mrb[17].mxu0 }
 0x975   :  { %v2078_v40 = vmul.f32 -1.442695, %v2004_v32 }
 0x977   :  { %2936 = vpow2.f32 %v2078_v40 }
 0x981   :  { %v2937_v44 = vpop.eup %2936 }
 0x982   :  { %v2010_v48 = vadd.f32 1.0, %v2937_v44 }
 0x984   :  { %2938 = vrcp.f32 %v2010_v48 }
 0x98e   :  { %v2939_v54 = vpop.eup %2938 }
 0x98f   :  { %2013 = vst [vmem:[#allocation11] sm:$0xff] %v2939_v54 }
 0x990   :  { %3061 = shalt.err (!%p3058_p2)
}
 0x991   :  { %s3062_s21 = scalar_lea.hbm %s3661_s6, 128 }
 0x992   :  { %p3063_p3 = scmp.ne.s32.totalorder %s3661_s6, %s3062_s21  ;;  %p3066_p4 = scmp.lt.u32.totalorder %s3062_s21, %s3661_s6 }
 0x994   :  { %p3068_p5 = pnand %p3066_p4, %p3063_p3 }
 0x996   :  { %3071 = shalt.err (!%p3068_p5)
}
 0x997   :  { %2024 = dma.vmem_to_hbm [thread:$0]  %s2022_s19, 128, %s3661_s6, [#allocation5]  }
 0x998   :  { %3078 = dma.done.wait [#allocation5], 128  }
 0x999   :  { %3079 = vsyncadd [#allocation5], 4294967168 }
 0x99a   :  { %3080 = dma.done.wait [#allocation13], 128  }
 0x99b   :  { %3081 = vsyncadd [#allocation13], 4294967168 }
 0x99c   :  { %2041 = vsyncpa [#allocation4], 1 }
 0x99d   :  { %2042 = vsyncpa [#allocation7], 1 }
 0x99e   :  { %2043 = vsyncpa [#allocation10], 1 }
 0x99f   :  { %2044 = vsyncpa [#allocation5], 1 }
 0x9a0   :  { %2045 = vsyncpa [#allocation13], 1 }

</bundles_post_ra>
